<compile_context>
chip_gen: v7x
topology: tpu7x:2x2x1
jax: 0.10.0
libtpu: 0.0.40
codegen_flags: <defaults>
</compile_context>

<pallas_src>
import functools

import jax
import jax.numpy as jnp
from jax.experimental import pallas as pl
from jax.experimental.pallas import tpu as pltpu


def _round_up(x, m):
    return (x + m - 1) // m * m


def _pad_gate_blocks(g, h, hp):
    """(..., 4h) -> (..., 4hp): zero-pad each gate block [i, f, g, o] to hp lanes."""
    if h == hp:
        return g
    pads = [(0, 0)] * (g.ndim - 1)
    parts = [jnp.pad(g[..., k * h:(k + 1) * h], pads + [(0, hp - h)])
             for k in range(4)]
    return jnp.concatenate(parts, axis=-1)


def _lstm_recurrence_kernel(gx_ref, whh_ref, hout_ref, h_sc, c_sc, *,
                            tc, hp, seq_len, unroll):
    """One grid step = tc sequential LSTM steps on a (Bt, Hp) state tile.

    gx_ref : (tc, Bt, 4*Hp) bf16  precomputed x@W_ih + b for this time chunk
    whh_ref: (Hp, 4*Hp)     bf16  recurrent weight, whole-array resident in VMEM
    hout_ref: (Bt, Hp)      f32   final hidden state (written on last time chunk)
    """
    t_idx = pl.program_id(1)

    @pl.when(t_idx == 0)
    def _():
        h_sc[...] = jnp.zeros_like(h_sc)
        c_sc[...] = jnp.zeros_like(c_sc)

    whh = whh_ref[...]                       # bf16, loop-invariant

    def step(k, carry):
        h, c = carry
        # Only the truly sequential part lives here; the input projection was
        # hoisted into the wrapper.  bf16 operands on the MXU, f32 accumulate.
        gates = gx_ref[k].astype(jnp.float32) + jnp.dot(
            h.astype(jnp.bfloat16), whh, preferred_element_type=jnp.float32)
        i_g = jax.nn.sigmoid(gates[:, 0 * hp:1 * hp])   # lane-aligned slices
        f_g = jax.nn.sigmoid(gates[:, 1 * hp:2 * hp])
        g_g = jnp.tanh(gates[:, 2 * hp:3 * hp])
        o_g = jax.nn.sigmoid(gates[:, 3 * hp:4 * hp])
        c_new = f_g * c + i_g * g_g
        h_new = o_g * jnp.tanh(c_new)
        if seq_len is not None:
            # Trailing padded time steps (T was padded up to nt*Tc): passthrough.
            valid = (t_idx * tc + k) < seq_len
            h_new = jnp.where(valid, h_new, h)
            c_new = jnp.where(valid, c_new, c)
        return h_new, c_new

    h_fin, c_fin = jax.lax.fori_loop(0, tc, step, (h_sc[...], c_sc[...]),
                                     unroll=unroll)
    h_sc[...] = h_fin
    c_sc[...] = c_fin

    @pl.when(t_idx == pl.num_programs(1) - 1)
    def _():
        hout_ref[...] = h_fin


def text_lstm_forward(token_ids, params, *, time_chunk_cap=16):
    """token_ids: (B, T) int32. Returns logits (B, num_classes) float32."""
    emb = params["embedding"]           # (V, E)
    w_ih = params["w_ih"]               # (E, 4H)   (transposed weight_ih_l0)
    w_hh = params["w_hh"]               # (H, 4H)   (transposed weight_hh_l0)
    b = params["b"]                     # (1, 4H)   (b_ih + b_hh)
    w_fc = params["w_fc"]               # (H, C)    (transposed fc.weight)
    b_fc = params["b_fc"]               # (1, C)

    B, T = token_ids.shape
    V, E = emb.shape
    H = w_hh.shape[0]

    # ---- TPU-friendly padded sizes ----------------------------------------
    Hp = _round_up(H, 128)              # lane width -> whole-vreg gate slices
    Bp0 = _round_up(max(B, 8), 8)       # f32 sublane multiple
    if Bp0 >= 256:
        Bt = 128                        # several tiles; both v7x TCs engaged
    elif Bp0 >= 128:
        Bt = _round_up(-(-Bp0 // 2), 16)  # nb == 2 so v7x's 2nd core isn't idle
    else:
        Bt = Bp0                        # small batch: single tile
    Bp = _round_up(Bp0, Bt)
    nb = Bp // Bt

    # ---- gate-block padding applied to the (small) weights, not activations
    w_ih_p = _pad_gate_blocks(w_ih, H, Hp)                            # (E, 4Hp)
    b_p = _pad_gate_blocks(b, H, Hp)                                  # (1, 4Hp)
    w_hh_p = _pad_gate_blocks(jnp.pad(w_hh, ((0, Hp - H), (0, 0))), H, Hp)
    w_hh_p = w_hh_p.astype(jnp.bfloat16)                              # (Hp, 4Hp)

    # ---- hoisted input projection: ONE large matmul (or a tiny-vocab gather),
    # produced directly in (T, B, 4*Hp) order, stored bf16 -------------------
    tok_t = token_ids.T                                               # (T, B)
    if V * 4 * Hp <= B * T * E:
        gate_tab = (emb @ w_ih_p + b_p).astype(jnp.bfloat16)          # (V, 4Hp)
        gates_x = jnp.take(gate_tab, tok_t, axis=0)                   # (T, B, 4Hp)
    else:
        x_emb = jnp.take(emb, tok_t, axis=0)                          # (T, B, E)
        gates_x = ((x_emb.reshape(T * B, E) @ w_ih_p).reshape(T, B, 4 * Hp)
                   + b_p).astype(jnp.bfloat16)

    # ---- time chunking: pad T up to a multiple of Tc, mask trailing steps --
    Tc = max(1, min(T, time_chunk_cap))
    # keep the double-buffered gx block within a v7x-safe VMEM budget
    gx_budget = 24 << 20
    while Tc > 1 and 2 * Tc * Bt * 4 * Hp * 2 > gx_budget:
        Tc = (Tc + 1) // 2
    nt = -(-T // Tc)
    Tp = nt * Tc
    masked = (Tp != T)

    gates_x = jnp.pad(gates_x, ((0, Tp - T), (0, Bp - B), (0, 0)))    # (Tp, Bp, 4Hp)

    # ---- unroll: full only when the live set fits the 64-vreg file ---------
    step_vregs = (Bt * 4 * Hp * 4) // 4096 + 6 * ((Bt * Hp * 4) // 4096 + 1)
    if step_vregs <= 32:
        unroll = True
    elif step_vregs <= 96:
        unroll = 4
    else:
        unroll = 2

    # ---- VMEM budget & cost estimate ---------------------------------------
    vmem_need = (2 * Tc * Bt * 4 * Hp * 2      # gx double buffer (bf16)
                 + Hp * 4 * Hp * 2             # W_hh, single-buffered in VMEM
                 + 2 * Bt * Hp * 4             # output double buffer (f32)
                 + 2 * Bt * Hp * 4)            # h/c scratch (f32)
    vmem_limit = int(max(32 << 20, min(int(vmem_need * 1.5) + (4 << 20), 64 << 20)))

    cost = pl.CostEstimate(
        flops=2 * Tp * Bp * Hp * (4 * Hp),
        transcendentals=5 * Tp * Bp * Hp,
        bytes_accessed=(Tp * Bp * 4 * Hp * 2 + Hp * 4 * Hp * 2 + Bp * Hp * 4),
    )

    h_last = pl.pallas_call(
        functools.partial(_lstm_recurrence_kernel, tc=Tc, hp=Hp,
                          seq_len=(T if masked else None), unroll=unroll),
        out_shape=jax.ShapeDtypeStruct((Bp, Hp), jnp.float32),
        grid_spec=pltpu.PrefetchScalarGridSpec(
            num_scalar_prefetch=0,
            grid=(nb, nt),                      # time axis innermost (carried)
            in_specs=[
                pl.BlockSpec((Tc, Bt, 4 * Hp), lambda bb, tt: (tt, bb, 0)),
                # whole W_hh resident in VMEM once (no double buffer)
                pl.BlockSpec(memory_space=pltpu.MemorySpace.VMEM),
            ],
            out_specs=pl.BlockSpec((Bt, Hp), lambda bb, tt: (bb, 0)),
            scratch_shapes=[
                pltpu.VMEM((Bt, Hp), jnp.float32),   # h state (carried over tt)
                pltpu.VMEM((Bt, Hp), jnp.float32),   # c state
            ],
        ),
        compiler_params=pltpu.CompilerParams(
            dimension_semantics=("parallel", "arbitrary"),
            vmem_limit_bytes=vmem_limit),
        cost_estimate=cost,
    )(gates_x, w_hh_p)

    # final FC on hidden[-1]; dropout is identity in eval mode
    return h_last[:B, :H] @ w_fc + b_fc[0]


def _reference_forward(token_ids, params):
    """Pure-JAX f32 reference of the same forward pass (for sanity checking)."""
    emb = params["embedding"]
    w_ih, w_hh, b = params["w_ih"], params["w_hh"], params["b"]
    w_fc, b_fc = params["w_fc"], params["b_fc"]
    H = w_hh.shape[0]

    x = jnp.take(emb, token_ids, axis=0)            # (B, T, E)
    B, T, _ = x.shape
    h = jnp.zeros((B, H), jnp.float32)
    c = jnp.zeros((B, H), jnp.float32)
    for t in range(T):
        gates = x[:, t, :] @ w_ih + h @ w_hh + b[0]
        i = jax.nn.sigmoid(gates[:, 0 * H:1 * H])
        f = jax.nn.sigmoid(gates[:, 1 * H:2 * H])
        g = jnp.tanh(gates[:, 2 * H:3 * H])
        o = jax.nn.sigmoid(gates[:, 3 * H:4 * H])
        c = f * c + i * g
        h = o * jnp.tanh(c)
    return h @ w_fc + b_fc[0]


def make_params(key, vocab_size, embed_size, hidden_size, num_classes):
    ks = jax.random.split(key, 7)
    s = 0.1
    return {
        "embedding": jax.random.normal(ks[0], (vocab_size, embed_size), jnp.float32) * s,
        "w_ih": jax.random.normal(ks[1], (embed_size, 4 * hidden_size), jnp.float32) * s,
        "w_hh": jax.random.normal(ks[2], (hidden_size, 4 * hidden_size), jnp.float32) * s,
        "b": (jax.random.normal(ks[3], (1, 4 * hidden_size), jnp.float32) * s
              + jax.random.normal(ks[4], (1, 4 * hidden_size), jnp.float32) * s),
        "w_fc": jax.random.normal(ks[5], (hidden_size, num_classes), jnp.float32) * s,
        "b_fc": jax.random.normal(ks[6], (1, num_classes), jnp.float32) * s,
    }


if __name__ == "__main__":
    B, T = 2, 8
    VOCAB, EMBED, HIDDEN, CLASSES = 16, 32, 32, 5

    key = jax.random.PRNGKey(0)
    k_tok, k_par = jax.random.split(key)
    token_ids = jax.random.randint(k_tok, (B, T), 0, VOCAB, dtype=jnp.int32)
    params = make_params(k_par, VOCAB, EMBED, HIDDEN, CLASSES)

    logits = jax.block_until_ready(text_lstm_forward(token_ids, params))
    ref = _reference_forward(token_ids, params)

    assert logits.shape == (B, CLASSES)
    # bf16 MXU operands / bf16 gx stream -> small drift vs the f32 reference.
    assert jnp.allclose(logits, ref, atol=1e-2, rtol=1e-2)
    print("KERNEL_OK")
</pallas_src>

<mosaic_0001>
module attributes {stable_mosaic.version = 11 : i64} {
  func.func @_lstm_recurrence_kernel(%arg0: i32, %arg1: i32, %arg2: memref<8x8x512xbf16, #tpu.memory_space<vmem>>, %arg3: memref<128x512xbf16, #tpu.memory_space<vmem>>, %arg4: memref<8x128xf32, #tpu.memory_space<vmem>>, %arg5: memref<8x128xf32, #tpu.memory_space<vmem>>, %arg6: memref<8x128xf32, #tpu.memory_space<vmem>>) attributes {dimension_semantics = [#tpu.dimension_semantics<parallel>, #tpu.dimension_semantics<arbitrary>], iteration_bounds = array<i64: 1, 1>, scalar_prefetch = 0 : i64, scratch_operands = 2 : i64, tpu.core_type = #tpu.core_type<tc>, window_params = [{transform_indices = @transform_0, window_bounds = array<i64: 8, 8, 512>}, {pipeline_mode = #tpu.pipeline_mode<synchronous>, transform_indices = @transform_1, window_bounds = array<i64: 128, 512>}, {transform_indices = @transform_2, window_bounds = array<i64: 8, 128>}]} {
    %c0_i32 = arith.constant 0 : i32
    %0 = arith.cmpi eq, %arg1, %c0_i32 : i32
    %1 = arith.extui %0 : i1 to i32
    %c0_i32_0 = arith.constant 0 : i32
    %2 = arith.cmpi ne, %1, %c0_i32_0 : i32
    scf.if %2 {
      %cst_60 = arith.constant 0.000000e+00 : f32
      %267 = vector.broadcast %cst_60 : f32 to vector<8x128xf32>
      %c0_61 = arith.constant 0 : index
      %c0_62 = arith.constant 0 : index
      %268 = vector.load %arg5[%c0_61, %c0_62] : memref<8x128xf32, #tpu.memory_space<vmem>>, vector<8x128xf32>
      tpu.vector_store %arg5[%c0_61, %c0_62], %267 {strides = array<i32>} : memref<8x128xf32, #tpu.memory_space<vmem>>, vector<8x128xf32>,
      %cst_63 = arith.constant 0.000000e+00 : f32
      %269 = vector.broadcast %cst_63 : f32 to vector<8x128xf32>
      %c0_64 = arith.constant 0 : index
      %c0_65 = arith.constant 0 : index
      %270 = vector.load %arg6[%c0_64, %c0_65] : memref<8x128xf32, #tpu.memory_space<vmem>>, vector<8x128xf32>
      tpu.vector_store %arg6[%c0_64, %c0_65], %269 {strides = array<i32>} : memref<8x128xf32, #tpu.memory_space<vmem>>, vector<8x128xf32>,
    } else {
    }
    %c0 = arith.constant 0 : index
    %c0_1 = arith.constant 0 : index
    %3 = vector.load %arg3[%c0, %c0_1] : memref<128x512xbf16, #tpu.memory_space<vmem>>, vector<128x512xbf16>
    %c0_2 = arith.constant 0 : index
    %c0_3 = arith.constant 0 : index
    %4 = vector.load %arg5[%c0_2, %c0_3] : memref<8x128xf32, #tpu.memory_space<vmem>>, vector<8x128xf32>
    %c0_4 = arith.constant 0 : index
    %c0_5 = arith.constant 0 : index
    %5 = vector.load %arg6[%c0_4, %c0_5] : memref<8x128xf32, #tpu.memory_space<vmem>>, vector<8x128xf32>
    %c0_i32_6 = arith.constant 0 : i32
    %6 = arith.index_cast %c0_i32_6 : i32 to index
    %c0_7 = arith.constant 0 : index
    %c0_8 = arith.constant 0 : index
    %7 = vector.load %arg2[%6, %c0_7, %c0_8] : memref<8x8x512xbf16, #tpu.memory_space<vmem>>, vector<1x8x512xbf16>
    %8 = vector.shape_cast %7 : vector<1x8x512xbf16> to vector<8x512xbf16>
    %9 = arith.extf %8 : vector<8x512xbf16> to vector<8x512xf32>
    %10 = arith.truncf %4 : vector<8x128xf32> to vector<8x128xbf16>
    %cst = arith.constant dense<0.000000e+00> : vector<8x512xf32>
    %11 = tpu.matmul %10, %3, %cst {dimension_numbers = #tpu.dot_dimension_numbers<[1], [0], [0], [1], [0, 0, 1, 1], [], []>} : vector<8x128xbf16>, vector<128x512xbf16>, vector<8x512xf32> -> vector<8x512xf32>
    %12 = arith.addf %9, %11 : vector<8x512xf32>
    %13 = vector.extract_strided_slice %12 {offsets = [0, 0], sizes = [8, 128], strides = [1, 1]} : vector<8x512xf32> to vector<8x128xf32>
    %14 = arith.negf %13 : vector<8x128xf32>
    %15 = math.exp %14 : vector<8x128xf32>
    %cst_9 = arith.constant 1.000000e+00 : f32
    %16 = vector.broadcast %cst_9 : f32 to vector<8x128xf32>
    %17 = arith.addf %16, %15 : vector<8x128xf32>
    %18 = arith.divf %16, %17 : vector<8x128xf32>
    %19 = vector.extract_strided_slice %12 {offsets = [0, 128], sizes = [8, 128], strides = [1, 1]} : vector<8x512xf32> to vector<8x128xf32>
    %20 = arith.negf %19 : vector<8x128xf32>
    %21 = math.exp %20 : vector<8x128xf32>
    %cst_10 = arith.constant 1.000000e+00 : f32
    %22 = vector.broadcast %cst_10 : f32 to vector<8x128xf32>
    %23 = arith.addf %22, %21 : vector<8x128xf32>
    %24 = arith.divf %22, %23 : vector<8x128xf32>
    %25 = vector.extract_strided_slice %12 {offsets = [0, 256], sizes = [8, 128], strides = [1, 1]} : vector<8x512xf32> to vector<8x128xf32>
    %26 = math.tanh %25 : vector<8x128xf32>
    %27 = vector.extract_strided_slice %12 {offsets = [0, 384], sizes = [8, 128], strides = [1, 1]} : vector<8x512xf32> to vector<8x128xf32>
    %28 = arith.negf %27 : vector<8x128xf32>
    %29 = math.exp %28 : vector<8x128xf32>
    %cst_11 = arith.constant 1.000000e+00 : f32
    %30 = vector.broadcast %cst_11 : f32 to vector<8x128xf32>
    %31 = arith.addf %30, %29 : vector<8x128xf32>
    %32 = arith.divf %30, %31 : vector<8x128xf32>
    %33 = arith.mulf %24, %5 : vector<8x128xf32>
    %34 = arith.mulf %18, %26 : vector<8x128xf32>
    %35 = arith.addf %33, %34 : vector<8x128xf32>
    %36 = math.tanh %35 : vector<8x128xf32>
    %37 = arith.mulf %32, %36 : vector<8x128xf32>
    %c1_i32 = arith.constant 1 : i32
    %38 = arith.index_cast %c1_i32 : i32 to index
    %c0_12 = arith.constant 0 : index
    %c0_13 = arith.constant 0 : index
    %39 = vector.load %arg2[%38, %c0_12, %c0_13] : memref<8x8x512xbf16, #tpu.memory_space<vmem>>, vector<1x8x512xbf16>
    %40 = vector.shape_cast %39 : vector<1x8x512xbf16> to vector<8x512xbf16>
    %41 = arith.extf %40 : vector<8x512xbf16> to vector<8x512xf32>
    %42 = arith.truncf %37 : vector<8x128xf32> to vector<8x128xbf16>
    %cst_14 = arith.constant dense<0.000000e+00> : vector<8x512xf32>
    %43 = tpu.matmul %42, %3, %cst_14 {dimension_numbers = #tpu.dot_dimension_numbers<[1], [0], [0], [1], [0, 0, 1, 1], [], []>} : vector<8x128xbf16>, vector<128x512xbf16>, vector<8x512xf32> -> vector<8x512xf32>
    %44 = arith.addf %41, %43 : vector<8x512xf32>
    %45 = vector.extract_strided_slice %44 {offsets = [0, 0], sizes = [8, 128], strides = [1, 1]} : vector<8x512xf32> to vector<8x128xf32>
    %46 = arith.negf %45 : vector<8x128xf32>
    %47 = math.exp %46 : vector<8x128xf32>
    %cst_15 = arith.constant 1.000000e+00 : f32
    %48 = vector.broadcast %cst_15 : f32 to vector<8x128xf32>
    %49 = arith.addf %48, %47 : vector<8x128xf32>
    %50 = arith.divf %48, %49 : vector<8x128xf32>
    %51 = vector.extract_strided_slice %44 {offsets = [0, 128], sizes = [8, 128], strides = [1, 1]} : vector<8x512xf32> to vector<8x128xf32>
    %52 = arith.negf %51 : vector<8x128xf32>
    %53 = math.exp %52 : vector<8x128xf32>
    %cst_16 = arith.constant 1.000000e+00 : f32
    %54 = vector.broadcast %cst_16 : f32 to vector<8x128xf32>
    %55 = arith.addf %54, %53 : vector<8x128xf32>
    %56 = arith.divf %54, %55 : vector<8x128xf32>
    %57 = vector.extract_strided_slice %44 {offsets = [0, 256], sizes = [8, 128], strides = [1, 1]} : vector<8x512xf32> to vector<8x128xf32>
    %58 = math.tanh %57 : vector<8x128xf32>
    %59 = vector.extract_strided_slice %44 {offsets = [0, 384], sizes = [8, 128], strides = [1, 1]} : vector<8x512xf32> to vector<8x128xf32>
    %60 = arith.negf %59 : vector<8x128xf32>
    %61 = math.exp %60 : vector<8x128xf32>
    %cst_17 = arith.constant 1.000000e+00 : f32
    %62 = vector.broadcast %cst_17 : f32 to vector<8x128xf32>
    %63 = arith.addf %62, %61 : vector<8x128xf32>
    %64 = arith.divf %62, %63 : vector<8x128xf32>
    %65 = arith.mulf %56, %35 : vector<8x128xf32>
    %66 = arith.mulf %50, %58 : vector<8x128xf32>
    %67 = arith.addf %65, %66 : vector<8x128xf32>
    %68 = math.tanh %67 : vector<8x128xf32>
    %69 = arith.mulf %64, %68 : vector<8x128xf32>
    %c2_i32 = arith.constant 2 : i32
    %70 = arith.index_cast %c2_i32 : i32 to index
    %c0_18 = arith.constant 0 : index
    %c0_19 = arith.constant 0 : index
    %71 = vector.load %arg2[%70, %c0_18, %c0_19] : memref<8x8x512xbf16, #tpu.memory_space<vmem>>, vector<1x8x512xbf16>
    %72 = vector.shape_cast %71 : vector<1x8x512xbf16> to vector<8x512xbf16>
    %73 = arith.extf %72 : vector<8x512xbf16> to vector<8x512xf32>
    %74 = arith.truncf %69 : vector<8x128xf32> to vector<8x128xbf16>
    %cst_20 = arith.constant dense<0.000000e+00> : vector<8x512xf32>
    %75 = tpu.matmul %74, %3, %cst_20 {dimension_numbers = #tpu.dot_dimension_numbers<[1], [0], [0], [1], [0, 0, 1, 1], [], []>} : vector<8x128xbf16>, vector<128x512xbf16>, vector<8x512xf32> -> vector<8x512xf32>
    %76 = arith.addf %73, %75 : vector<8x512xf32>
    %77 = vector.extract_strided_slice %76 {offsets = [0, 0], sizes = [8, 128], strides = [1, 1]} : vector<8x512xf32> to vector<8x128xf32>
    %78 = arith.negf %77 : vector<8x128xf32>
    %79 = math.exp %78 : vector<8x128xf32>
    %cst_21 = arith.constant 1.000000e+00 : f32
    %80 = vector.broadcast %cst_21 : f32 to vector<8x128xf32>
    %81 = arith.addf %80, %79 : vector<8x128xf32>
    %82 = arith.divf %80, %81 : vector<8x128xf32>
    %83 = vector.extract_strided_slice %76 {offsets = [0, 128], sizes = [8, 128], strides = [1, 1]} : vector<8x512xf32> to vector<8x128xf32>
    %84 = arith.negf %83 : vector<8x128xf32>
    %85 = math.exp %84 : vector<8x128xf32>
    %cst_22 = arith.constant 1.000000e+00 : f32
    %86 = vector.broadcast %cst_22 : f32 to vector<8x128xf32>
    %87 = arith.addf %86, %85 : vector<8x128xf32>
    %88 = arith.divf %86, %87 : vector<8x128xf32>
    %89 = vector.extract_strided_slice %76 {offsets = [0, 256], sizes = [8, 128], strides = [1, 1]} : vector<8x512xf32> to vector<8x128xf32>
    %90 = math.tanh %89 : vector<8x128xf32>
    %91 = vector.extract_strided_slice %76 {offsets = [0, 384], sizes = [8, 128], strides = [1, 1]} : vector<8x512xf32> to vector<8x128xf32>
    %92 = arith.negf %91 : vector<8x128xf32>
    %93 = math.exp %92 : vector<8x128xf32>
    %cst_23 = arith.constant 1.000000e+00 : f32
    %94 = vector.broadcast %cst_23 : f32 to vector<8x128xf32>
    %95 = arith.addf %94, %93 : vector<8x128xf32>
    %96 = arith.divf %94, %95 : vector<8x128xf32>
    %97 = arith.mulf %88, %67 : vector<8x128xf32>
    %98 = arith.mulf %82, %90 : vector<8x128xf32>
    %99 = arith.addf %97, %98 : vector<8x128xf32>
    %100 = math.tanh %99 : vector<8x128xf32>
    %101 = arith.mulf %96, %100 : vector<8x128xf32>
    %c3_i32 = arith.constant 3 : i32
    %102 = arith.index_cast %c3_i32 : i32 to index
    %c0_24 = arith.constant 0 : index
    %c0_25 = arith.constant 0 : index
    %103 = vector.load %arg2[%102, %c0_24, %c0_25] : memref<8x8x512xbf16, #tpu.memory_space<vmem>>, vector<1x8x512xbf16>
    %104 = vector.shape_cast %103 : vector<1x8x512xbf16> to vector<8x512xbf16>
    %105 = arith.extf %104 : vector<8x512xbf16> to vector<8x512xf32>
    %106 = arith.truncf %101 : vector<8x128xf32> to vector<8x128xbf16>
    %cst_26 = arith.constant dense<0.000000e+00> : vector<8x512xf32>
    %107 = tpu.matmul %106, %3, %cst_26 {dimension_numbers = #tpu.dot_dimension_numbers<[1], [0], [0], [1], [0, 0, 1, 1], [], []>} : vector<8x128xbf16>, vector<128x512xbf16>, vector<8x512xf32> -> vector<8x512xf32>
    %108 = arith.addf %105, %107 : vector<8x512xf32>
    %109 = vector.extract_strided_slice %108 {offsets = [0, 0], sizes = [8, 128], strides = [1, 1]} : vector<8x512xf32> to vector<8x128xf32>
    %110 = arith.negf %109 : vector<8x128xf32>
    %111 = math.exp %110 : vector<8x128xf32>
    %cst_27 = arith.constant 1.000000e+00 : f32
    %112 = vector.broadcast %cst_27 : f32 to vector<8x128xf32>
    %113 = arith.addf %112, %111 : vector<8x128xf32>
    %114 = arith.divf %112, %113 : vector<8x128xf32>
    %115 = vector.extract_strided_slice %108 {offsets = [0, 128], sizes = [8, 128], strides = [1, 1]} : vector<8x512xf32> to vector<8x128xf32>
    %116 = arith.negf %115 : vector<8x128xf32>
    %117 = math.exp %116 : vector<8x128xf32>
    %cst_28 = arith.constant 1.000000e+00 : f32
    %118 = vector.broadcast %cst_28 : f32 to vector<8x128xf32>
    %119 = arith.addf %118, %117 : vector<8x128xf32>
    %120 = arith.divf %118, %119 : vector<8x128xf32>
    %121 = vector.extract_strided_slice %108 {offsets = [0, 256], sizes = [8, 128], strides = [1, 1]} : vector<8x512xf32> to vector<8x128xf32>
    %122 = math.tanh %121 : vector<8x128xf32>
    %123 = vector.extract_strided_slice %108 {offsets = [0, 384], sizes = [8, 128], strides = [1, 1]} : vector<8x512xf32> to vector<8x128xf32>
    %124 = arith.negf %123 : vector<8x128xf32>
    %125 = math.exp %124 : vector<8x128xf32>
    %cst_29 = arith.constant 1.000000e+00 : f32
    %126 = vector.broadcast %cst_29 : f32 to vector<8x128xf32>
    %127 = arith.addf %126, %125 : vector<8x128xf32>
    %128 = arith.divf %126, %127 : vector<8x128xf32>
    %129 = arith.mulf %120, %99 : vector<8x128xf32>
    %130 = arith.mulf %114, %122 : vector<8x128xf32>
    %131 = arith.addf %129, %130 : vector<8x128xf32>
    %132 = math.tanh %131 : vector<8x128xf32>
    %133 = arith.mulf %128, %132 : vector<8x128xf32>
    %c4_i32 = arith.constant 4 : i32
    %134 = arith.index_cast %c4_i32 : i32 to index
    %c0_30 = arith.constant 0 : index
    %c0_31 = arith.constant 0 : index
    %135 = vector.load %arg2[%134, %c0_30, %c0_31] : memref<8x8x512xbf16, #tpu.memory_space<vmem>>, vector<1x8x512xbf16>
    %136 = vector.shape_cast %135 : vector<1x8x512xbf16> to vector<8x512xbf16>
    %137 = arith.extf %136 : vector<8x512xbf16> to vector<8x512xf32>
    %138 = arith.truncf %133 : vector<8x128xf32> to vector<8x128xbf16>
    %cst_32 = arith.constant dense<0.000000e+00> : vector<8x512xf32>
    %139 = tpu.matmul %138, %3, %cst_32 {dimension_numbers = #tpu.dot_dimension_numbers<[1], [0], [0], [1], [0, 0, 1, 1], [], []>} : vector<8x128xbf16>, vector<128x512xbf16>, vector<8x512xf32> -> vector<8x512xf32>
    %140 = arith.addf %137, %139 : vector<8x512xf32>
    %141 = vector.extract_strided_slice %140 {offsets = [0, 0], sizes = [8, 128], strides = [1, 1]} : vector<8x512xf32> to vector<8x128xf32>
    %142 = arith.negf %141 : vector<8x128xf32>
    %143 = math.exp %142 : vector<8x128xf32>
    %cst_33 = arith.constant 1.000000e+00 : f32
    %144 = vector.broadcast %cst_33 : f32 to vector<8x128xf32>
    %145 = arith.addf %144, %143 : vector<8x128xf32>
    %146 = arith.divf %144, %145 : vector<8x128xf32>
    %147 = vector.extract_strided_slice %140 {offsets = [0, 128], sizes = [8, 128], strides = [1, 1]} : vector<8x512xf32> to vector<8x128xf32>
    %148 = arith.negf %147 : vector<8x128xf32>
    %149 = math.exp %148 : vector<8x128xf32>
    %cst_34 = arith.constant 1.000000e+00 : f32
    %150 = vector.broadcast %cst_34 : f32 to vector<8x128xf32>
    %151 = arith.addf %150, %149 : vector<8x128xf32>
    %152 = arith.divf %150, %151 : vector<8x128xf32>
    %153 = vector.extract_strided_slice %140 {offsets = [0, 256], sizes = [8, 128], strides = [1, 1]} : vector<8x512xf32> to vector<8x128xf32>
    %154 = math.tanh %153 : vector<8x128xf32>
    %155 = vector.extract_strided_slice %140 {offsets = [0, 384], sizes = [8, 128], strides = [1, 1]} : vector<8x512xf32> to vector<8x128xf32>
    %156 = arith.negf %155 : vector<8x128xf32>
    %157 = math.exp %156 : vector<8x128xf32>
    %cst_35 = arith.constant 1.000000e+00 : f32
    %158 = vector.broadcast %cst_35 : f32 to vector<8x128xf32>
    %159 = arith.addf %158, %157 : vector<8x128xf32>
    %160 = arith.divf %158, %159 : vector<8x128xf32>
    %161 = arith.mulf %152, %131 : vector<8x128xf32>
    %162 = arith.mulf %146, %154 : vector<8x128xf32>
    %163 = arith.addf %161, %162 : vector<8x128xf32>
    %164 = math.tanh %163 : vector<8x128xf32>
    %165 = arith.mulf %160, %164 : vector<8x128xf32>
    %c5_i32 = arith.constant 5 : i32
    %166 = arith.index_cast %c5_i32 : i32 to index
    %c0_36 = arith.constant 0 : index
    %c0_37 = arith.constant 0 : index
    %167 = vector.load %arg2[%166, %c0_36, %c0_37] : memref<8x8x512xbf16, #tpu.memory_space<vmem>>, vector<1x8x512xbf16>
    %168 = vector.shape_cast %167 : vector<1x8x512xbf16> to vector<8x512xbf16>
    %169 = arith.extf %168 : vector<8x512xbf16> to vector<8x512xf32>
    %170 = arith.truncf %165 : vector<8x128xf32> to vector<8x128xbf16>
    %cst_38 = arith.constant dense<0.000000e+00> : vector<8x512xf32>
    %171 = tpu.matmul %170, %3, %cst_38 {dimension_numbers = #tpu.dot_dimension_numbers<[1], [0], [0], [1], [0, 0, 1, 1], [], []>} : vector<8x128xbf16>, vector<128x512xbf16>, vector<8x512xf32> -> vector<8x512xf32>
    %172 = arith.addf %169, %171 : vector<8x512xf32>
    %173 = vector.extract_strided_slice %172 {offsets = [0, 0], sizes = [8, 128], strides = [1, 1]} : vector<8x512xf32> to vector<8x128xf32>
    %174 = arith.negf %173 : vector<8x128xf32>
    %175 = math.exp %174 : vector<8x128xf32>
    %cst_39 = arith.constant 1.000000e+00 : f32
    %176 = vector.broadcast %cst_39 : f32 to vector<8x128xf32>
    %177 = arith.addf %176, %175 : vector<8x128xf32>
    %178 = arith.divf %176, %177 : vector<8x128xf32>
    %179 = vector.extract_strided_slice %172 {offsets = [0, 128], sizes = [8, 128], strides = [1, 1]} : vector<8x512xf32> to vector<8x128xf32>
    %180 = arith.negf %179 : vector<8x128xf32>
    %181 = math.exp %180 : vector<8x128xf32>
    %cst_40 = arith.constant 1.000000e+00 : f32
    %182 = vector.broadcast %cst_40 : f32 to vector<8x128xf32>
    %183 = arith.addf %182, %181 : vector<8x128xf32>
    %184 = arith.divf %182, %183 : vector<8x128xf32>
    %185 = vector.extract_strided_slice %172 {offsets = [0, 256], sizes = [8, 128], strides = [1, 1]} : vector<8x512xf32> to vector<8x128xf32>
    %186 = math.tanh %185 : vector<8x128xf32>
    %187 = vector.extract_strided_slice %172 {offsets = [0, 384], sizes = [8, 128], strides = [1, 1]} : vector<8x512xf32> to vector<8x128xf32>
    %188 = arith.negf %187 : vector<8x128xf32>
    %189 = math.exp %188 : vector<8x128xf32>
    %cst_41 = arith.constant 1.000000e+00 : f32
    %190 = vector.broadcast %cst_41 : f32 to vector<8x128xf32>
    %191 = arith.addf %190, %189 : vector<8x128xf32>
    %192 = arith.divf %190, %191 : vector<8x128xf32>
    %193 = arith.mulf %184, %163 : vector<8x128xf32>
    %194 = arith.mulf %178, %186 : vector<8x128xf32>
    %195 = arith.addf %193, %194 : vector<8x128xf32>
    %196 = math.tanh %195 : vector<8x128xf32>
    %197 = arith.mulf %192, %196 : vector<8x128xf32>
    %c6_i32 = arith.constant 6 : i32
    %198 = arith.index_cast %c6_i32 : i32 to index
    %c0_42 = arith.constant 0 : index
    %c0_43 = arith.constant 0 : index
    %199 = vector.load %arg2[%198, %c0_42, %c0_43] : memref<8x8x512xbf16, #tpu.memory_space<vmem>>, vector<1x8x512xbf16>
    %200 = vector.shape_cast %199 : vector<1x8x512xbf16> to vector<8x512xbf16>
    %201 = arith.extf %200 : vector<8x512xbf16> to vector<8x512xf32>
    %202 = arith.truncf %197 : vector<8x128xf32> to vector<8x128xbf16>
    %cst_44 = arith.constant dense<0.000000e+00> : vector<8x512xf32>
    %203 = tpu.matmul %202, %3, %cst_44 {dimension_numbers = #tpu.dot_dimension_numbers<[1], [0], [0], [1], [0, 0, 1, 1], [], []>} : vector<8x128xbf16>, vector<128x512xbf16>, vector<8x512xf32> -> vector<8x512xf32>
    %204 = arith.addf %201, %203 : vector<8x512xf32>
    %205 = vector.extract_strided_slice %204 {offsets = [0, 0], sizes = [8, 128], strides = [1, 1]} : vector<8x512xf32> to vector<8x128xf32>
    %206 = arith.negf %205 : vector<8x128xf32>
    %207 = math.exp %206 : vector<8x128xf32>
    %cst_45 = arith.constant 1.000000e+00 : f32
    %208 = vector.broadcast %cst_45 : f32 to vector<8x128xf32>
    %209 = arith.addf %208, %207 : vector<8x128xf32>
    %210 = arith.divf %208, %209 : vector<8x128xf32>
    %211 = vector.extract_strided_slice %204 {offsets = [0, 128], sizes = [8, 128], strides = [1, 1]} : vector<8x512xf32> to vector<8x128xf32>
    %212 = arith.negf %211 : vector<8x128xf32>
    %213 = math.exp %212 : vector<8x128xf32>
    %cst_46 = arith.constant 1.000000e+00 : f32
    %214 = vector.broadcast %cst_46 : f32 to vector<8x128xf32>
    %215 = arith.addf %214, %213 : vector<8x128xf32>
    %216 = arith.divf %214, %215 : vector<8x128xf32>
    %217 = vector.extract_strided_slice %204 {offsets = [0, 256], sizes = [8, 128], strides = [1, 1]} : vector<8x512xf32> to vector<8x128xf32>
    %218 = math.tanh %217 : vector<8x128xf32>
    %219 = vector.extract_strided_slice %204 {offsets = [0, 384], sizes = [8, 128], strides = [1, 1]} : vector<8x512xf32> to vector<8x128xf32>
    %220 = arith.negf %219 : vector<8x128xf32>
    %221 = math.exp %220 : vector<8x128xf32>
    %cst_47 = arith.constant 1.000000e+00 : f32
    %222 = vector.broadcast %cst_47 : f32 to vector<8x128xf32>
    %223 = arith.addf %222, %221 : vector<8x128xf32>
    %224 = arith.divf %222, %223 : vector<8x128xf32>
    %225 = arith.mulf %216, %195 : vector<8x128xf32>
    %226 = arith.mulf %210, %218 : vector<8x128xf32>
    %227 = arith.addf %225, %226 : vector<8x128xf32>
    %228 = math.tanh %227 : vector<8x128xf32>
    %229 = arith.mulf %224, %228 : vector<8x128xf32>
    %c7_i32 = arith.constant 7 : i32
    %230 = arith.index_cast %c7_i32 : i32 to index
    %c0_48 = arith.constant 0 : index
    %c0_49 = arith.constant 0 : index
    %231 = vector.load %arg2[%230, %c0_48, %c0_49] : memref<8x8x512xbf16, #tpu.memory_space<vmem>>, vector<1x8x512xbf16>
    %232 = vector.shape_cast %231 : vector<1x8x512xbf16> to vector<8x512xbf16>
    %233 = arith.extf %232 : vector<8x512xbf16> to vector<8x512xf32>
    %234 = arith.truncf %229 : vector<8x128xf32> to vector<8x128xbf16>
    %cst_50 = arith.constant dense<0.000000e+00> : vector<8x512xf32>
    %235 = tpu.matmul %234, %3, %cst_50 {dimension_numbers = #tpu.dot_dimension_numbers<[1], [0], [0], [1], [0, 0, 1, 1], [], []>} : vector<8x128xbf16>, vector<128x512xbf16>, vector<8x512xf32> -> vector<8x512xf32>
    %236 = arith.addf %233, %235 : vector<8x512xf32>
    %237 = vector.extract_strided_slice %236 {offsets = [0, 0], sizes = [8, 128], strides = [1, 1]} : vector<8x512xf32> to vector<8x128xf32>
    %238 = arith.negf %237 : vector<8x128xf32>
    %239 = math.exp %238 : vector<8x128xf32>
    %cst_51 = arith.constant 1.000000e+00 : f32
    %240 = vector.broadcast %cst_51 : f32 to vector<8x128xf32>
    %241 = arith.addf %240, %239 : vector<8x128xf32>
    %242 = arith.divf %240, %241 : vector<8x128xf32>
    %243 = vector.extract_strided_slice %236 {offsets = [0, 128], sizes = [8, 128], strides = [1, 1]} : vector<8x512xf32> to vector<8x128xf32>
    %244 = arith.negf %243 : vector<8x128xf32>
    %245 = math.exp %244 : vector<8x128xf32>
    %cst_52 = arith.constant 1.000000e+00 : f32
    %246 = vector.broadcast %cst_52 : f32 to vector<8x128xf32>
    %247 = arith.addf %246, %245 : vector<8x128xf32>
    %248 = arith.divf %246, %247 : vector<8x128xf32>
    %249 = vector.extract_strided_slice %236 {offsets = [0, 256], sizes = [8, 128], strides = [1, 1]} : vector<8x512xf32> to vector<8x128xf32>
    %250 = math.tanh %249 : vector<8x128xf32>
    %251 = vector.extract_strided_slice %236 {offsets = [0, 384], sizes = [8, 128], strides = [1, 1]} : vector<8x512xf32> to vector<8x128xf32>
    %252 = arith.negf %251 : vector<8x128xf32>
    %253 = math.exp %252 : vector<8x128xf32>
    %cst_53 = arith.constant 1.000000e+00 : f32
    %254 = vector.broadcast %cst_53 : f32 to vector<8x128xf32>
    %255 = arith.addf %254, %253 : vector<8x128xf32>
    %256 = arith.divf %254, %255 : vector<8x128xf32>
    %257 = arith.mulf %248, %227 : vector<8x128xf32>
    %258 = arith.mulf %242, %250 : vector<8x128xf32>
    %259 = arith.addf %257, %258 : vector<8x128xf32>
    %260 = math.tanh %259 : vector<8x128xf32>
    %261 = arith.mulf %256, %260 : vector<8x128xf32>
    %c8_i32 = arith.constant 8 : i32
    %c0_54 = arith.constant 0 : index
    %c0_55 = arith.constant 0 : index
    %262 = vector.load %arg5[%c0_54, %c0_55] : memref<8x128xf32, #tpu.memory_space<vmem>>, vector<8x128xf32>
    tpu.vector_store %arg5[%c0_54, %c0_55], %261 {strides = array<i32>} : memref<8x128xf32, #tpu.memory_space<vmem>>, vector<8x128xf32>,
    %c0_56 = arith.constant 0 : index
    %c0_57 = arith.constant 0 : index
    %263 = vector.load %arg6[%c0_56, %c0_57] : memref<8x128xf32, #tpu.memory_space<vmem>>, vector<8x128xf32>
    tpu.vector_store %arg6[%c0_56, %c0_57], %259 {strides = array<i32>} : memref<8x128xf32, #tpu.memory_space<vmem>>, vector<8x128xf32>,
    %c0_i32_58 = arith.constant 0 : i32
    %264 = arith.cmpi eq, %arg1, %c0_i32_58 : i32
    %265 = arith.extui %264 : i1 to i32
    %c0_i32_59 = arith.constant 0 : i32
    %266 = arith.cmpi ne, %265, %c0_i32_59 : i32
    scf.if %266 {
      %c0_60 = arith.constant 0 : index
      %c0_61 = arith.constant 0 : index
      %267 = vector.load %arg4[%c0_60, %c0_61] : memref<8x128xf32, #tpu.memory_space<vmem>>, vector<8x128xf32>
      tpu.vector_store %arg4[%c0_60, %c0_61], %261 {strides = array<i32>} : memref<8x128xf32, #tpu.memory_space<vmem>>, vector<8x128xf32>,
    } else {
    }
    return
  }
  func.func @transform_0(%arg0: i32, %arg1: i32) -> (i32, i32, i32) {
    %c0_i32 = arith.constant 0 : i32
    %c0_i32_0 = arith.constant 0 : i32
    return %arg1, %arg0, %c0_i32 : i32, i32, i32
  }
  func.func @transform_1(%arg0: i32, %arg1: i32) -> (i32, i32) {
    %c0_i32 = arith.constant 0 : i32
    %c0_i32_0 = arith.constant 0 : i32
    %c0_i32_1 = arith.constant 0 : i32
    return %c0_i32, %c0_i32_0 : i32, i32
  }
  func.func @transform_2(%arg0: i32, %arg1: i32) -> (i32, i32) {
    %c0_i32 = arith.constant 0 : i32
    %c0_i32_0 = arith.constant 0 : i32
    return %arg0, %c0_i32 : i32, i32
  }
}

</mosaic_0001>

<bundles_post_ra>
// kernel: tpu_custom_call.1
= control target key start
LH: loop header
LB: loop body
LE: loop exit
PB: predicated region body
PF: predicated region fallthrough
CT: control target
= control target key end

     0   :  { %7 = vsyncpa [#allocation5], 0  ;;  %s1935_s0 = inlined_call_operand.hbm [shape: bf16[8,8,512], index: 0, kind: input, shape index: {}]   ;;  %s1936_s1 = inlined_call_operand.hbm [shape: bf16[128,512], index: 1, kind: input, shape index: {}]   ;;  %s1937_s2 = inlined_call_operand.hbm [shape: f32[8,128], index: 2, kind: output, shape index: {}]  }
   0x1   :  { %8 = vsyncpa [#allocation8], 0 }
   0x2   :  { %9 = vsyncpa [#allocation6], 0  ;;  %s1549_s9 = smov [#allocation4]   ;;  %s1477_s13 = scalar_lea.hbm %s1935_s0, 2048 }
   0x3   :  { %s15_s10 = sshll.u32 %s1549_s9, 4  ;;  %p1478_p0 = scmp.ne.s32.totalorder %s1935_s0, %s1477_s13  ;;  %s16_s10 = int_to_ptr.vmem [resolvable:$true] %s15_s10 }
   0x4   :  { %p1481_p1 = scmp.lt.u32.totalorder %s1477_s13, %s1935_s0 }
   0x6   :  { %p1483_p2 = pnand %p1481_p1, %p1478_p0 }
   0x8   :  { %1486 = shalt.err (!%p1483_p2)
}
   0x9   :  { %s1487_s18 = scalar_lea.vmem %s16_s10, 2048  ;;  %p1492_p4 = scmp.lt.s32.totalorder %s16_s10, %s16_s10 }
   0xa   :  { %p1488_p3 = scmp.ne.s32.totalorder %s16_s10, %s1487_s18  ;;  %p1493_p5 = scmp.lt.s32.totalorder %s1487_s18, %s1487_s18 }
   0xc   :  { %p1494_p6 = por %p1493_p5, %p1492_p4 }
   0xe   :  { %p1495_p7 = pnand %p1494_p6, %p1488_p3 }
  0x10   :  { %1498 = shalt.err (!%p1495_p7)
}
  0x11   :  { %s1550_s19 = smov 256   ;;  %s1551_s20 = smov 16  }
  0x12   :  { %21 = dma.hbm_to_vmem [thread:$0]  %s1935_s0, 2048, %s16_s10, [#allocation5], %s1550_s19, %s1550_s19, %s1551_s20  }
  0x13   :  { %s1552_s23 = smov [#allocation7]   ;;  %s1499_s27 = scalar_lea.hbm %s1936_s1, 4096 }
  0x14   :  { %s27_s24 = sshll.u32 %s1552_s23, 4  ;;  %p1500_p8 = scmp.ne.s32.totalorder %s1936_s1, %s1499_s27  ;;  %s28_s24 = int_to_ptr.vmem [resolvable:$true] %s27_s24 }
  0x15   :  { %p1503_p9 = scmp.lt.u32.totalorder %s1499_s27, %s1936_s1 }
  0x17   :  { %p1505_p10 = pnand %p1503_p9, %p1500_p8 }
  0x19   :  { %1508 = shalt.err (!%p1505_p10)
}
  0x1a   :  { %s1509_s4 = scalar_lea.vmem %s28_s24, 4096  ;;  %p1514_p12 = scmp.lt.s32.totalorder %s28_s24, %s28_s24 }
  0x1b   :  { %p1510_p11 = scmp.ne.s32.totalorder %s28_s24, %s1509_s4  ;;  %p1515_p13 = scmp.lt.s32.totalorder %s1509_s4, %s1509_s4 }
  0x1d   :  { %p1516_p0 = por %p1515_p13, %p1514_p12 }
  0x1f   :  { %p1517_p1 = pnand %p1516_p0, %p1510_p11 }
  0x21   :  { %1520 = shalt.err (!%p1517_p1)
}
  0x22   :  { %33 = dma.hbm_to_vmem [thread:$0]  %s1936_s1, 4096, %s28_s24, [#allocation8], %s1550_s19, %s1550_s19, %s1551_s20  }
  0x23   :  { %1543 = dma.done.wait [#allocation5], 2048  }
  0x24   :  { %1544 = vsyncadd [#allocation5], 4294965248 }
  0x25   :  { %1545 = dma.done.wait [#allocation8], 4096  }
  0x26   :  { %1546 = vsyncadd [#allocation8], 4294963200  ;;  %v1553_v0 = vmov 0   ;;  %v1597_v1 = vld [vmem:[#allocation7 + $0x4] ss:$16 sps:$4 sm:$0xff]   ;;  %v1554_v33 = vmov 0.0|0.0  }
  0x27   :  { %280 = vmatprep.mubr.bf16.mxu0 %v1553_v0  ;;  %321 = vmatprep.mubr.bf16.mxu1 %v1553_v0  ;;  %v1599_v2 = vld [vmem:[#allocation7] ss:$16 sps:$4 sm:$0xff]   ;;  %v1602_v3 = vld [vmem:[#allocation7 + $0x24] ss:$16 sps:$4 sm:$0xff]   ;;  %v1610_v6 = vld [vmem:[#allocation7 + $0xc] ss:$16 sps:$4 sm:$0xff]  }
  0x28   :  { %248 = vmatprep.subr.bf16.mxu0 %v1597_v1  ;;  %v1605_v4 = vld [vmem:[#allocation7 + $0x20] ss:$16 sps:$4 sm:$0xff]   ;;  %v1608_v5 = vld [vmem:[#allocation7 + $0x44] ss:$16 sps:$4 sm:$0xff]   ;;  %v1612_v7 = vld [vmem:[#allocation7 + $0x8] ss:$16 sps:$4 sm:$0xff]   ;;  %289 = vmatprep.subr.bf16.mxu1 %v1610_v6 }
  0x29   :  { %249 = vmatpush1.bf16.msra.mxu0 %v1599_v2  ;;  %v1615_v8 = vld [vmem:[#allocation7 + $0x40] ss:$16 sps:$4 sm:$0xff]   ;;  %v1619_v9 = vld [vmem:[#allocation7 + $0x64] ss:$16 sps:$4 sm:$0xff]   ;;  %290 = vmatpush1.bf16.msra.mxu1 %v1612_v7  ;;  %v1622_v10 = vld [vmem:[#allocation7 + $0x2c] ss:$16 sps:$4 sm:$0xff]  }
  0x2a   :  { %250 = vmatprep.subr.bf16.mxu0 %v1602_v3  ;;  %v1624_v11 = vld [vmem:[#allocation7 + $0x28] ss:$16 sps:$4 sm:$0xff]   ;;  %291 = vmatprep.subr.bf16.mxu1 %v1622_v10  ;;  %v1628_v12 = vld [vmem:[#allocation7 + $0x60] ss:$16 sps:$4 sm:$0xff]   ;;  %v1630_v13 = vld [vmem:[#allocation7 + $0x84] ss:$16 sps:$4 sm:$0xff]  }
  0x2b   :  { %v1632_v14 = vld [vmem:[#allocation7 + $0x4c] ss:$16 sps:$4 sm:$0xff]   ;;  %v1636_v15 = vld [vmem:[#allocation7 + $0x48] ss:$16 sps:$4 sm:$0xff]   ;;  %v1642_v17 = vld [vmem:[#allocation7 + $0x80] ss:$16 sps:$4 sm:$0xff]  }
  0x2c   :  { %v1639_v16 = vld [vmem:[#allocation7 + $0x6c] ss:$16 sps:$4 sm:$0xff]   ;;  %v1645_v18 = vld [vmem:[#allocation7 + $0xa4] ss:$16 sps:$4 sm:$0xff]   ;;  %v1648_v19 = vld [vmem:[#allocation7 + $0x68] ss:$16 sps:$4 sm:$0xff]  }
  0x2d   :  { %251 = vmatpush1.bf16.msra.mxu0 %v1605_v4  ;;  %292 = vmatpush1.bf16.msra.mxu1 %v1624_v11  ;;  %v1651_v20 = vld [vmem:[#allocation7 + $0x8c] ss:$16 sps:$4 sm:$0xff]   ;;  %v1654_v21 = vld [vmem:[#allocation7 + $0xa0] ss:$16 sps:$4 sm:$0xff]   ;;  %v1656_v22 = vld [vmem:[#allocation7 + $0xc4] ss:$16 sps:$4 sm:$0xff]  }
  0x2e   :  { %252 = vmatprep.subr.bf16.mxu0 %v1608_v5  ;;  %293 = vmatprep.subr.bf16.mxu1 %v1632_v14  ;;  %v1660_v23 = vld [vmem:[#allocation7 + $0x88] ss:$16 sps:$4 sm:$0xff]   ;;  %v1663_v24 = vld [vmem:[#allocation7 + $0xac] ss:$16 sps:$4 sm:$0xff]   ;;  %v1666_v25 = vld [vmem:[#allocation7 + $0xc0] ss:$16 sps:$4 sm:$0xff]  }
  0x2f   :  { %v1669_v26 = vld [vmem:[#allocation7 + $0xe4] ss:$16 sps:$4 sm:$0xff]   ;;  %v1672_v27 = vld [vmem:[#allocation7 + $0xa8] ss:$16 sps:$4 sm:$0xff]   ;;  %v1675_v28 = vld [vmem:[#allocation7 + $0xcc] ss:$16 sps:$4 sm:$0xff]  }
  0x30   :  { %v1678_v29 = vld [vmem:[#allocation7 + $0xe0] ss:$16 sps:$4 sm:$0xff]   ;;  %v1682_v30 = vld [vmem:[#allocation7 + $0xc8] ss:$16 sps:$4 sm:$0xff]   ;;  %v1685_v31 = vld [vmem:[#allocation7 + $0xec] ss:$16 sps:$4 sm:$0xff]  }
  0x31   :  { %253 = vmatpush1.bf16.msra.mxu0 %v1615_v8  ;;  %294 = vmatpush1.bf16.msra.mxu1 %v1636_v15  ;;  %v1689_v32 = vld [vmem:[#allocation7 + $0xe8] ss:$16 sps:$4 sm:$0xff]   ;;  %v81_v34 = vld [vmem:[#allocation4] sm:$0xff]  ;;  %s1555_s1 = smov [#allocation9]  }
  0x32   :  { %254 = vmatprep.subr.bf16.mxu0 %v1619_v9  ;;  %295 = vmatprep.subr.bf16.mxu1 %v1639_v16  ;;  %v83_v35 = vunpack.c.l.bf16 %v81_v34  ;;  %v84_v36 = vunpack.c.h.bf16 %v81_v34  ;;  %v82_v38 = vld [vmem:[#allocation4 + $0x8] sm:$0xff]  ;;  %s1196_s6 = sshll.u32 %s1555_s1, 4  ;;  %s1197_s6 = int_to_ptr.vmem [resolvable:$true] %s1196_s6 }
  0x33   :  { %v86_v45 = vunpack.c.h.bf16 %v82_v38  ;;  %v85_v51 = vunpack.c.l.bf16 %v82_v38  ;;  %s1521_s7 = scalar_lea.vmem %s1197_s6, 128  ;;  %p1526_p3 = scmp.lt.s32.totalorder %s1197_s6, %s1197_s6 }
  0x34   :  { %p1522_p2 = scmp.ne.s32.totalorder %s1197_s6, %s1521_s7  ;;  %p1527_p4 = scmp.lt.s32.totalorder %s1521_s7, %s1521_s7 }
  0x35   :  { %255 = vmatpush1.bf16.msra.mxu0 %v1628_v12  ;;  %296 = vmatpush1.bf16.msra.mxu1 %v1648_v19 }
  0x36   :  { %256 = vmatprep.subr.bf16.mxu0 %v1630_v13  ;;  %297 = vmatprep.subr.bf16.mxu1 %v1651_v20  ;;  %p1528_p5 = por %p1527_p4, %p1526_p3 }
  0x38   :  { %p1529_p6 = pnand %p1528_p5, %p1522_p2 }
  0x39   :  { %257 = vmatpush1.bf16.msra.mxu0 %v1642_v17  ;;  %298 = vmatpush1.bf16.msra.mxu1 %v1660_v23 }
  0x3a   :  { %258 = vmatprep.subr.bf16.mxu0 %v1645_v18  ;;  %299 = vmatprep.subr.bf16.mxu1 %v1663_v24 }
  0x3d   :  { %259 = vmatpush1.bf16.msra.mxu0 %v1654_v21  ;;  %300 = vmatpush1.bf16.msra.mxu1 %v1672_v27 }
  0x3e   :  { %260 = vmatprep.subr.bf16.mxu0 %v1656_v22  ;;  %301 = vmatprep.subr.bf16.mxu1 %v1675_v28 }
  0x41   :  { %261 = vmatpush1.bf16.msra.mxu0 %v1666_v25  ;;  %302 = vmatpush1.bf16.msra.mxu1 %v1682_v30 }
  0x42   :  { %262 = vmatprep.subr.bf16.mxu0 %v1669_v26  ;;  %303 = vmatprep.subr.bf16.mxu1 %v1685_v31 }
  0x45   :  { %263 = vmatpush1.bf16.msra.mxu0 %v1678_v29  ;;  %304 = vmatpush1.bf16.msra.mxu1 %v1689_v32 }
  0x46   :  { %366 = vmatprep.subr.bf16.mxu0 %v1597_v1  ;;  %407 = vmatprep.subr.bf16.mxu1 %v1610_v6 }
  0x48   :  { %281 = vmatmul.mubr.bf16.vlgmr.msra.gmra.mrb[0].mxu0 %v1554_v33  ;;  %322 = vmatmul.mubr.bf16.vlgmr.msra.gmra.mrb[0].mxu1 %v1554_v33 }
  0x49   :  { %367 = vmatpush1.bf16.msra.mxu0 %v1599_v2  ;;  %398 = vmatprep.mubr.bf16.mxu0 %v1553_v0 }
  0x4a   :  { %368 = vmatprep.subr.bf16.mxu0 %v1602_v3  ;;  %408 = vmatpush1.bf16.msra.mxu1 %v1612_v7 }
  0x4b   :  { %409 = vmatprep.subr.bf16.mxu1 %v1622_v10  ;;  %439 = vmatprep.mubr.bf16.mxu1 %v1553_v0 }
  0x4d   :  { %369 = vmatpush1.bf16.msra.mxu0 %v1605_v4 }
  0x4e   :  { %370 = vmatprep.subr.bf16.mxu0 %v1608_v5  ;;  %410 = vmatpush1.bf16.msra.mxu1 %v1624_v11 }
  0x4f   :  { %411 = vmatprep.subr.bf16.mxu1 %v1632_v14 }
  0x51   :  { %371 = vmatpush1.bf16.msra.mxu0 %v1615_v8 }
  0x52   :  { %372 = vmatprep.subr.bf16.mxu0 %v1619_v9  ;;  %412 = vmatpush1.bf16.msra.mxu1 %v1636_v15 }
  0x53   :  { %413 = vmatprep.subr.bf16.mxu1 %v1639_v16 }
  0x55   :  { %373 = vmatpush1.bf16.msra.mxu0 %v1628_v12 }
  0x56   :  { %374 = vmatprep.subr.bf16.mxu0 %v1630_v13  ;;  %414 = vmatpush1.bf16.msra.mxu1 %v1648_v19 }
  0x57   :  { %415 = vmatprep.subr.bf16.mxu1 %v1651_v20 }
  0x59   :  { %375 = vmatpush1.bf16.msra.mxu0 %v1642_v17 }
  0x5a   :  { %376 = vmatprep.subr.bf16.mxu0 %v1645_v18  ;;  %416 = vmatpush1.bf16.msra.mxu1 %v1660_v23 }
  0x5b   :  { %417 = vmatprep.subr.bf16.mxu1 %v1663_v24 }
  0x5d   :  { %377 = vmatpush1.bf16.msra.mxu0 %v1654_v21 }
  0x5e   :  { %378 = vmatprep.subr.bf16.mxu0 %v1656_v22  ;;  %418 = vmatpush1.bf16.msra.mxu1 %v1672_v27 }
  0x5f   :  { %419 = vmatprep.subr.bf16.mxu1 %v1675_v28 }
  0x61   :  { %379 = vmatpush1.bf16.msra.mxu0 %v1666_v25 }
  0x62   :  { %380 = vmatprep.subr.bf16.mxu0 %v1669_v26  ;;  %420 = vmatpush1.bf16.msra.mxu1 %v1682_v30 }
  0x63   :  { %421 = vmatprep.subr.bf16.mxu1 %v1685_v31 }
  0x65   :  { %381 = vmatpush1.bf16.msra.mxu0 %v1678_v29 }
  0x66   :  { %484 = vmatprep.subr.bf16.mxu0 %v1597_v1  ;;  %422 = vmatpush1.bf16.msra.mxu1 %v1689_v32 }
  0x67   :  { %525 = vmatprep.subr.bf16.mxu1 %v1610_v6 }
 0x11b   :  { %v282_v37 = vpop.f32.mrb[0].mxu0  ;;  %v323_v47 = vpop.f32.mrb[0].mxu1 }
 0x11c   :  { %v330_v39 = vadd.f32 %v282_v37, %v83_v35  ;;  %v284_v40 = vpop.f32.mrb[1].mxu0  ;;  %v325_v48 = vpop.f32.mrb[1].mxu1  ;;  %v332_v54 = vadd.f32 %v323_v47, %v85_v51 }
 0x11d   :  { %v331_v41 = vadd.f32 %v284_v40, %v84_v36  ;;  %v286_v42 = vpop.f32.mrb[2].mxu0  ;;  %v333_v49 = vadd.f32 %v325_v48, %v86_v45  ;;  %v327_v50 = vpop.f32.mrb[2].mxu1  ;;  %v359_v40 = vld [vmem:[#allocation4 + $0x10] sm:$0xff] }
 0x11e   :  { %v1238_v43 = vmul.f32 -1.442695, %v330_v39  ;;  %v287_v44 = vpop.f32.mrb[3].mxu0  ;;  %v328_v52 = vpop.f32.mrb[3].mxu1  ;;  %v362_v42 = vunpack.c.h.bf16 %v359_v40 }
 0x11f   :  { %v1239_v46 = vmul.f32 -1.442695, %v331_v41  ;;  %v1240_v53 = vmul.f32 -1.442695, %v333_v49  ;;  %v361_v41 = vunpack.c.l.bf16 %v359_v40 }
 0x120   :  { %1317 = vpow2.f32 %v1238_v43 }
 0x121   :  { %1319 = vpow2.f32 %v1239_v46  ;;  %v360_v46 = vld [vmem:[#allocation4 + $0x18] sm:$0xff] }
 0x122   :  { %1321 = vpow2.f32 %v1240_v53 }
 0x123   :  { %1323 = vtanh.f32 %v332_v54 }
 0x12a   :  { %v1318_v55 = vpop.eup %1317 }
 0x12b   :  { %v1320_v56 = vpop.eup %1319  ;;  %v337_v57 = vadd.f32 1.0, %v1318_v55 }
 0x12c   :  { %v343_v58 = vadd.f32 1.0, %v1320_v56  ;;  %v1322_v59 = vpop.eup %1321  ;;  %v364_v56 = vunpack.c.h.bf16 %v360_v46 }
 0x12d   :  { %1325 = vrcp.f32 %v337_v57  ;;  %v1324_v60 = vpop.eup %1323  ;;  %v350_v62 = vadd.f32 1.0, %v1322_v59 }
 0x12e   :  { %1327 = vrcp.f32 %v343_v58  ;;  %v363_v58 = vunpack.c.l.bf16 %v360_v46 }
 0x12f   :  { %1329 = vrcp.f32 %v350_v62 }
 0x137   :  { %v1326_v61 = vpop.eup %1325 }
 0x138   :  { %v1328_v63 = vpop.eup %1327  ;;  %v354_v33 = vmul.f32 %v1326_v61, %v1324_v60 }
 0x139   :  { %v353_v34 = vmul.f32 0.0, %v1328_v63  ;;  %v1330_v36 = vpop.eup %1329 }
 0x13b   :  { %v1729_v35 = vadd.f32 %v354_v33, %v353_v34 }
 0x13d   :  { %1331 = vtanh.f32 %v1729_v35 }
 0x147   :  { %v1332_v37 = vpop.eup %1331 }
 0x148   :  { %v357_v38 = vmul.f32 %v1332_v37, %v1330_v36 }
 0x14a   :  { %v365_v39 = vpack.c.bf16 %v357_v38, %v357_v38 }
 0x14c   :  { %399 = vmatmul.mubr.bf16.vlgmr.msra.gmra.mrb[4].mxu0 %v365_v39  ;;  %440 = vmatmul.mubr.bf16.vlgmr.msra.gmra.mrb[4].mxu1 %v365_v39 }
 0x14d   :  { %485 = vmatpush1.bf16.msra.mxu0 %v1599_v2  ;;  %526 = vmatpush1.bf16.msra.mxu1 %v1612_v7 }
 0x14e   :  { %486 = vmatprep.subr.bf16.mxu0 %v1602_v3  ;;  %527 = vmatprep.subr.bf16.mxu1 %v1622_v10 }
 0x14f   :  { %516 = vmatprep.mubr.bf16.mxu0 %v1553_v0  ;;  %557 = vmatprep.mubr.bf16.mxu1 %v1553_v0 }
 0x151   :  { %487 = vmatpush1.bf16.msra.mxu0 %v1605_v4  ;;  %528 = vmatpush1.bf16.msra.mxu1 %v1624_v11 }
 0x152   :  { %488 = vmatprep.subr.bf16.mxu0 %v1608_v5  ;;  %529 = vmatprep.subr.bf16.mxu1 %v1632_v14 }
 0x155   :  { %489 = vmatpush1.bf16.msra.mxu0 %v1615_v8  ;;  %530 = vmatpush1.bf16.msra.mxu1 %v1636_v15 }
 0x156   :  { %490 = vmatprep.subr.bf16.mxu0 %v1619_v9  ;;  %531 = vmatprep.subr.bf16.mxu1 %v1639_v16 }
 0x159   :  { %491 = vmatpush1.bf16.msra.mxu0 %v1628_v12  ;;  %532 = vmatpush1.bf16.msra.mxu1 %v1648_v19 }
 0x15a   :  { %492 = vmatprep.subr.bf16.mxu0 %v1630_v13  ;;  %533 = vmatprep.subr.bf16.mxu1 %v1651_v20 }
 0x15d   :  { %493 = vmatpush1.bf16.msra.mxu0 %v1642_v17  ;;  %534 = vmatpush1.bf16.msra.mxu1 %v1660_v23 }
 0x15e   :  { %494 = vmatprep.subr.bf16.mxu0 %v1645_v18  ;;  %535 = vmatprep.subr.bf16.mxu1 %v1663_v24 }
 0x161   :  { %495 = vmatpush1.bf16.msra.mxu0 %v1654_v21  ;;  %536 = vmatpush1.bf16.msra.mxu1 %v1672_v27 }
 0x162   :  { %496 = vmatprep.subr.bf16.mxu0 %v1656_v22  ;;  %537 = vmatprep.subr.bf16.mxu1 %v1675_v28 }
 0x165   :  { %497 = vmatpush1.bf16.msra.mxu0 %v1666_v25  ;;  %538 = vmatpush1.bf16.msra.mxu1 %v1682_v30 }
 0x166   :  { %498 = vmatprep.subr.bf16.mxu0 %v1669_v26  ;;  %539 = vmatprep.subr.bf16.mxu1 %v1685_v31 }
 0x169   :  { %499 = vmatpush1.bf16.msra.mxu0 %v1678_v29  ;;  %540 = vmatpush1.bf16.msra.mxu1 %v1689_v32 }
 0x16a   :  { %602 = vmatprep.subr.bf16.mxu0 %v1597_v1  ;;  %643 = vmatprep.subr.bf16.mxu1 %v1610_v6 }
 0x21f   :  { %v400_v43 = vpop.f32.mrb[4].mxu0  ;;  %v441_v44 = vpop.f32.mrb[4].mxu1 }
 0x220   :  { %v448_v45 = vadd.f32 %v400_v43, %v361_v41  ;;  %v402_v47 = vpop.f32.mrb[5].mxu0  ;;  %v443_v48 = vpop.f32.mrb[5].mxu1  ;;  %v450_v60 = vadd.f32 %v441_v44, %v363_v58 }
 0x221   :  { %v449_v49 = vadd.f32 %v402_v47, %v362_v42  ;;  %v404_v50 = vpop.f32.mrb[6].mxu0  ;;  %v445_v51 = vpop.f32.mrb[6].mxu1  ;;  %v451_v57 = vadd.f32 %v443_v48, %v364_v56 }
 0x222   :  { %v1241_v52 = vmul.f32 -1.442695, %v448_v45  ;;  %v405_v53 = vpop.f32.mrb[7].mxu0  ;;  %v446_v54 = vpop.f32.mrb[7].mxu1 }
 0x223   :  { %v1242_v55 = vmul.f32 -1.442695, %v449_v49  ;;  %v1243_v59 = vmul.f32 -1.442695, %v451_v57 }
 0x224   :  { %1333 = vpow2.f32 %v1241_v52  ;;  %v478_v52 = vld [vmem:[#allocation4 + $0x28] sm:$0xff] }
 0x225   :  { %1335 = vpow2.f32 %v1242_v55 }
 0x226   :  { %1337 = vpow2.f32 %v1243_v59 }
 0x227   :  { %1339 = vtanh.f32 %v450_v60 }
 0x22e   :  { %v1334_v61 = vpop.eup %1333 }
 0x22f   :  { %v1336_v62 = vpop.eup %1335  ;;  %v455_v63 = vadd.f32 1.0, %v1334_v61 }
 0x230   :  { %v461_v33 = vadd.f32 1.0, %v1336_v62  ;;  %v1338_v34 = vpop.eup %1337  ;;  %v482_v62 = vunpack.c.h.bf16 %v478_v52 }
 0x231   :  { %1341 = vrcp.f32 %v455_v63  ;;  %v1340_v36 = vpop.eup %1339  ;;  %v468_v40 = vadd.f32 1.0, %v1338_v34 }
 0x232   :  { %1343 = vrcp.f32 %v461_v33  ;;  %v481_v33 = vunpack.c.l.bf16 %v478_v52 }
 0x233   :  { %1345 = vrcp.f32 %v468_v40 }
 0x23b   :  { %v1342_v37 = vpop.eup %1341 }
 0x23c   :  { %v1344_v38 = vpop.eup %1343  ;;  %v472_v39 = vmul.f32 %v1342_v37, %v1340_v36 }
 0x23d   :  { %v471_v41 = vmul.f32 %v1344_v38, %v1729_v35  ;;  %v1346_v43 = vpop.eup %1345  ;;  %v477_v35 = vld [vmem:[#allocation4 + $0x20] sm:$0xff] }
 0x23e   :  { %v479_v47 = vunpack.c.l.bf16 %v477_v35  ;;  %v480_v48 = vunpack.c.h.bf16 %v477_v35 }
 0x23f   :  { %v1767_v42 = vadd.f32 %v472_v39, %v471_v41 }
 0x241   :  { %1347 = vtanh.f32 %v1767_v42 }
 0x24b   :  { %v1348_v44 = vpop.eup %1347 }
 0x24c   :  { %v475_v45 = vmul.f32 %v1348_v44, %v1346_v43 }
 0x24e   :  { %v483_v46 = vpack.c.bf16 %v475_v45, %v475_v45 }
 0x250   :  { %517 = vmatmul.mubr.bf16.vlgmr.msra.gmra.mrb[8].mxu0 %v483_v46  ;;  %558 = vmatmul.mubr.bf16.vlgmr.msra.gmra.mrb[8].mxu1 %v483_v46 }
 0x251   :  { %603 = vmatpush1.bf16.msra.mxu0 %v1599_v2  ;;  %644 = vmatpush1.bf16.msra.mxu1 %v1612_v7 }
 0x252   :  { %604 = vmatprep.subr.bf16.mxu0 %v1602_v3  ;;  %645 = vmatprep.subr.bf16.mxu1 %v1622_v10 }
 0x253   :  { %634 = vmatprep.mubr.bf16.mxu0 %v1553_v0  ;;  %675 = vmatprep.mubr.bf16.mxu1 %v1553_v0 }
 0x255   :  { %605 = vmatpush1.bf16.msra.mxu0 %v1605_v4  ;;  %646 = vmatpush1.bf16.msra.mxu1 %v1624_v11 }
 0x256   :  { %606 = vmatprep.subr.bf16.mxu0 %v1608_v5  ;;  %647 = vmatprep.subr.bf16.mxu1 %v1632_v14 }
 0x259   :  { %607 = vmatpush1.bf16.msra.mxu0 %v1615_v8  ;;  %648 = vmatpush1.bf16.msra.mxu1 %v1636_v15 }
 0x25a   :  { %608 = vmatprep.subr.bf16.mxu0 %v1619_v9  ;;  %649 = vmatprep.subr.bf16.mxu1 %v1639_v16 }
 0x25d   :  { %609 = vmatpush1.bf16.msra.mxu0 %v1628_v12  ;;  %650 = vmatpush1.bf16.msra.mxu1 %v1648_v19 }
 0x25e   :  { %610 = vmatprep.subr.bf16.mxu0 %v1630_v13  ;;  %651 = vmatprep.subr.bf16.mxu1 %v1651_v20 }
 0x261   :  { %611 = vmatpush1.bf16.msra.mxu0 %v1642_v17  ;;  %652 = vmatpush1.bf16.msra.mxu1 %v1660_v23 }
 0x262   :  { %612 = vmatprep.subr.bf16.mxu0 %v1645_v18  ;;  %653 = vmatprep.subr.bf16.mxu1 %v1663_v24 }
 0x265   :  { %613 = vmatpush1.bf16.msra.mxu0 %v1654_v21  ;;  %654 = vmatpush1.bf16.msra.mxu1 %v1672_v27 }
 0x266   :  { %614 = vmatprep.subr.bf16.mxu0 %v1656_v22  ;;  %655 = vmatprep.subr.bf16.mxu1 %v1675_v28 }
 0x269   :  { %615 = vmatpush1.bf16.msra.mxu0 %v1666_v25  ;;  %656 = vmatpush1.bf16.msra.mxu1 %v1682_v30 }
 0x26a   :  { %616 = vmatprep.subr.bf16.mxu0 %v1669_v26  ;;  %657 = vmatprep.subr.bf16.mxu1 %v1685_v31 }
 0x26d   :  { %617 = vmatpush1.bf16.msra.mxu0 %v1678_v29  ;;  %658 = vmatpush1.bf16.msra.mxu1 %v1689_v32 }
 0x26e   :  { %720 = vmatprep.subr.bf16.mxu0 %v1597_v1  ;;  %761 = vmatprep.subr.bf16.mxu1 %v1610_v6 }
 0x323   :  { %v518_v49 = vpop.f32.mrb[8].mxu0  ;;  %v559_v50 = vpop.f32.mrb[8].mxu1 }
 0x324   :  { %v566_v51 = vadd.f32 %v518_v49, %v479_v47  ;;  %v520_v53 = vpop.f32.mrb[9].mxu0  ;;  %v561_v54 = vpop.f32.mrb[9].mxu1  ;;  %v568_v36 = vadd.f32 %v559_v50, %v481_v33 }
 0x325   :  { %v567_v55 = vadd.f32 %v520_v53, %v480_v48  ;;  %v522_v56 = vpop.f32.mrb[10].mxu0  ;;  %v563_v57 = vpop.f32.mrb[10].mxu1  ;;  %v569_v63 = vadd.f32 %v561_v54, %v482_v62 }
 0x326   :  { %v1244_v58 = vmul.f32 -1.442695, %v566_v51  ;;  %v523_v59 = vpop.f32.mrb[11].mxu0  ;;  %v564_v60 = vpop.f32.mrb[11].mxu1 }
 0x327   :  { %v1245_v61 = vmul.f32 -1.442695, %v567_v55  ;;  %v1246_v34 = vmul.f32 -1.442695, %v569_v63 }
 0x328   :  { %1349 = vpow2.f32 %v1244_v58  ;;  %v596_v58 = vld [vmem:[#allocation4 + $0x38] sm:$0xff] }
 0x329   :  { %1351 = vpow2.f32 %v1245_v61 }
 0x32a   :  { %1353 = vpow2.f32 %v1246_v34 }
 0x32b   :  { %1355 = vtanh.f32 %v568_v36 }
 0x332   :  { %v1350_v37 = vpop.eup %1349 }
 0x333   :  { %v1352_v38 = vpop.eup %1351  ;;  %v573_v39 = vadd.f32 1.0, %v1350_v37 }
 0x334   :  { %v579_v40 = vadd.f32 1.0, %v1352_v38  ;;  %v1354_v41 = vpop.eup %1353  ;;  %v600_v38 = vunpack.c.h.bf16 %v596_v58 }
 0x335   :  { %1357 = vrcp.f32 %v573_v39  ;;  %v1356_v43 = vpop.eup %1355  ;;  %v586_v35 = vadd.f32 1.0, %v1354_v41 }
 0x336   :  { %1359 = vrcp.f32 %v579_v40  ;;  %v599_v40 = vunpack.c.l.bf16 %v596_v58 }
 0x337   :  { %1361 = vrcp.f32 %v586_v35 }
 0x33f   :  { %v1358_v44 = vpop.eup %1357 }
 0x340   :  { %v1360_v45 = vpop.eup %1359  ;;  %v590_v46 = vmul.f32 %v1358_v44, %v1356_v43 }
 0x341   :  { %v589_v47 = vmul.f32 %v1360_v45, %v1767_v42  ;;  %v1362_v49 = vpop.eup %1361  ;;  %v595_v42 = vld [vmem:[#allocation4 + $0x30] sm:$0xff] }
 0x342   :  { %v597_v53 = vunpack.c.l.bf16 %v595_v42  ;;  %v598_v54 = vunpack.c.h.bf16 %v595_v42 }
 0x343   :  { %v1805_v48 = vadd.f32 %v590_v46, %v589_v47 }
 0x345   :  { %1363 = vtanh.f32 %v1805_v48 }
 0x34f   :  { %v1364_v50 = vpop.eup %1363 }
 0x350   :  { %v593_v51 = vmul.f32 %v1364_v50, %v1362_v49 }
 0x352   :  { %v601_v52 = vpack.c.bf16 %v593_v51, %v593_v51 }
 0x354   :  { %635 = vmatmul.mubr.bf16.vlgmr.msra.gmra.mrb[12].mxu0 %v601_v52  ;;  %676 = vmatmul.mubr.bf16.vlgmr.msra.gmra.mrb[12].mxu1 %v601_v52 }
 0x355   :  { %721 = vmatpush1.bf16.msra.mxu0 %v1599_v2  ;;  %762 = vmatpush1.bf16.msra.mxu1 %v1612_v7 }
 0x356   :  { %722 = vmatprep.subr.bf16.mxu0 %v1602_v3  ;;  %763 = vmatprep.subr.bf16.mxu1 %v1622_v10 }
 0x357   :  { %752 = vmatprep.mubr.bf16.mxu0 %v1553_v0  ;;  %793 = vmatprep.mubr.bf16.mxu1 %v1553_v0 }
 0x359   :  { %723 = vmatpush1.bf16.msra.mxu0 %v1605_v4  ;;  %764 = vmatpush1.bf16.msra.mxu1 %v1624_v11 }
 0x35a   :  { %724 = vmatprep.subr.bf16.mxu0 %v1608_v5  ;;  %765 = vmatprep.subr.bf16.mxu1 %v1632_v14 }
 0x35d   :  { %725 = vmatpush1.bf16.msra.mxu0 %v1615_v8  ;;  %766 = vmatpush1.bf16.msra.mxu1 %v1636_v15 }
 0x35e   :  { %726 = vmatprep.subr.bf16.mxu0 %v1619_v9  ;;  %767 = vmatprep.subr.bf16.mxu1 %v1639_v16 }
 0x361   :  { %727 = vmatpush1.bf16.msra.mxu0 %v1628_v12  ;;  %768 = vmatpush1.bf16.msra.mxu1 %v1648_v19 }
 0x362   :  { %728 = vmatprep.subr.bf16.mxu0 %v1630_v13  ;;  %769 = vmatprep.subr.bf16.mxu1 %v1651_v20 }
 0x365   :  { %729 = vmatpush1.bf16.msra.mxu0 %v1642_v17  ;;  %770 = vmatpush1.bf16.msra.mxu1 %v1660_v23 }
 0x366   :  { %730 = vmatprep.subr.bf16.mxu0 %v1645_v18  ;;  %771 = vmatprep.subr.bf16.mxu1 %v1663_v24 }
 0x369   :  { %731 = vmatpush1.bf16.msra.mxu0 %v1654_v21  ;;  %772 = vmatpush1.bf16.msra.mxu1 %v1672_v27 }
 0x36a   :  { %732 = vmatprep.subr.bf16.mxu0 %v1656_v22  ;;  %773 = vmatprep.subr.bf16.mxu1 %v1675_v28 }
 0x36d   :  { %733 = vmatpush1.bf16.msra.mxu0 %v1666_v25  ;;  %774 = vmatpush1.bf16.msra.mxu1 %v1682_v30 }
 0x36e   :  { %734 = vmatprep.subr.bf16.mxu0 %v1669_v26  ;;  %775 = vmatprep.subr.bf16.mxu1 %v1685_v31 }
 0x371   :  { %735 = vmatpush1.bf16.msra.mxu0 %v1678_v29  ;;  %776 = vmatpush1.bf16.msra.mxu1 %v1689_v32 }
 0x372   :  { %838 = vmatprep.subr.bf16.mxu0 %v1597_v1  ;;  %879 = vmatprep.subr.bf16.mxu1 %v1610_v6 }
 0x427   :  { %v636_v55 = vpop.f32.mrb[12].mxu0  ;;  %v677_v56 = vpop.f32.mrb[12].mxu1 }
 0x428   :  { %v684_v57 = vadd.f32 %v636_v55, %v597_v53  ;;  %v638_v59 = vpop.f32.mrb[13].mxu0  ;;  %v679_v60 = vpop.f32.mrb[13].mxu1  ;;  %v686_v43 = vadd.f32 %v677_v56, %v599_v40 }
 0x429   :  { %v685_v61 = vadd.f32 %v638_v59, %v598_v54  ;;  %v640_v62 = vpop.f32.mrb[14].mxu0  ;;  %v681_v63 = vpop.f32.mrb[14].mxu1  ;;  %v687_v39 = vadd.f32 %v679_v60, %v600_v38 }
 0x42a   :  { %v1247_v33 = vmul.f32 -1.442695, %v684_v57  ;;  %v641_v34 = vpop.f32.mrb[15].mxu0  ;;  %v682_v36 = vpop.f32.mrb[15].mxu1 }
 0x42b   :  { %v1248_v37 = vmul.f32 -1.442695, %v685_v61  ;;  %v1249_v41 = vmul.f32 -1.442695, %v687_v39 }
 0x42c   :  { %1365 = vpow2.f32 %v1247_v33  ;;  %v714_v33 = vld [vmem:[#allocation4 + $0x48] sm:$0xff] }
 0x42d   :  { %1367 = vpow2.f32 %v1248_v37 }
 0x42e   :  { %1369 = vpow2.f32 %v1249_v41 }
 0x42f   :  { %1371 = vtanh.f32 %v686_v43 }
 0x436   :  { %v1366_v44 = vpop.eup %1365 }
 0x437   :  { %v1368_v45 = vpop.eup %1367  ;;  %v691_v46 = vadd.f32 1.0, %v1366_v44 }
 0x438   :  { %v697_v35 = vadd.f32 1.0, %v1368_v45  ;;  %v1370_v47 = vpop.eup %1369  ;;  %v718_v45 = vunpack.c.h.bf16 %v714_v33 }
 0x439   :  { %1373 = vrcp.f32 %v691_v46  ;;  %v1372_v49 = vpop.eup %1371  ;;  %v704_v42 = vadd.f32 1.0, %v1370_v47 }
 0x43a   :  { %1375 = vrcp.f32 %v697_v35 }
 0x43b   :  { %1377 = vrcp.f32 %v704_v42 }
 0x443   :  { %v1374_v50 = vpop.eup %1373 }
 0x444   :  { %v1376_v51 = vpop.eup %1375  ;;  %v708_v52 = vmul.f32 %v1374_v50, %v1372_v49 }
 0x445   :  { %v707_v53 = vmul.f32 %v1376_v51, %v1805_v48  ;;  %v1378_v55 = vpop.eup %1377  ;;  %v713_v48 = vld [vmem:[#allocation4 + $0x40] sm:$0xff] }
 0x446   :  { %v715_v59 = vunpack.c.l.bf16 %v713_v48  ;;  %v716_v60 = vunpack.c.h.bf16 %v713_v48 }
 0x447   :  { %v1843_v54 = vadd.f32 %v708_v52, %v707_v53 }
 0x449   :  { %1379 = vtanh.f32 %v1843_v54 }
 0x453   :  { %v1380_v56 = vpop.eup %1379 }
 0x454   :  { %v711_v57 = vmul.f32 %v1380_v56, %v1378_v55 }
 0x456   :  { %v719_v58 = vpack.c.bf16 %v711_v57, %v711_v57 }
 0x458   :  { %753 = vmatmul.mubr.bf16.vlgmr.msra.gmra.mrb[16].mxu0 %v719_v58  ;;  %794 = vmatmul.mubr.bf16.vlgmr.msra.gmra.mrb[16].mxu1 %v719_v58 }
 0x459   :  { %839 = vmatpush1.bf16.msra.mxu0 %v1599_v2  ;;  %880 = vmatpush1.bf16.msra.mxu1 %v1612_v7 }
 0x45a   :  { %840 = vmatprep.subr.bf16.mxu0 %v1602_v3  ;;  %881 = vmatprep.subr.bf16.mxu1 %v1622_v10 }
 0x45b   :  { %870 = vmatprep.mubr.bf16.mxu0 %v1553_v0  ;;  %911 = vmatprep.mubr.bf16.mxu1 %v1553_v0 }
 0x45d   :  { %841 = vmatpush1.bf16.msra.mxu0 %v1605_v4  ;;  %882 = vmatpush1.bf16.msra.mxu1 %v1624_v11 }
 0x45e   :  { %842 = vmatprep.subr.bf16.mxu0 %v1608_v5  ;;  %883 = vmatprep.subr.bf16.mxu1 %v1632_v14 }
 0x461   :  { %843 = vmatpush1.bf16.msra.mxu0 %v1615_v8  ;;  %884 = vmatpush1.bf16.msra.mxu1 %v1636_v15 }
 0x462   :  { %844 = vmatprep.subr.bf16.mxu0 %v1619_v9  ;;  %885 = vmatprep.subr.bf16.mxu1 %v1639_v16 }
 0x465   :  { %845 = vmatpush1.bf16.msra.mxu0 %v1628_v12  ;;  %886 = vmatpush1.bf16.msra.mxu1 %v1648_v19 }
 0x466   :  { %846 = vmatprep.subr.bf16.mxu0 %v1630_v13  ;;  %887 = vmatprep.subr.bf16.mxu1 %v1651_v20 }
 0x469   :  { %847 = vmatpush1.bf16.msra.mxu0 %v1642_v17  ;;  %888 = vmatpush1.bf16.msra.mxu1 %v1660_v23 }
 0x46a   :  { %848 = vmatprep.subr.bf16.mxu0 %v1645_v18  ;;  %889 = vmatprep.subr.bf16.mxu1 %v1663_v24 }
 0x46d   :  { %849 = vmatpush1.bf16.msra.mxu0 %v1654_v21  ;;  %890 = vmatpush1.bf16.msra.mxu1 %v1672_v27 }
 0x46e   :  { %850 = vmatprep.subr.bf16.mxu0 %v1656_v22  ;;  %891 = vmatprep.subr.bf16.mxu1 %v1675_v28 }
 0x471   :  { %851 = vmatpush1.bf16.msra.mxu0 %v1666_v25  ;;  %892 = vmatpush1.bf16.msra.mxu1 %v1682_v30 }
 0x472   :  { %852 = vmatprep.subr.bf16.mxu0 %v1669_v26  ;;  %893 = vmatprep.subr.bf16.mxu1 %v1685_v31 }
 0x475   :  { %853 = vmatpush1.bf16.msra.mxu0 %v1678_v29  ;;  %894 = vmatpush1.bf16.msra.mxu1 %v1689_v32 }
 0x476   :  { %956 = vmatprep.subr.bf16.mxu0 %v1597_v1  ;;  %997 = vmatprep.subr.bf16.mxu1 %v1610_v6  ;;  %v717_v6 = vunpack.c.l.bf16 %v714_v33 }
 0x52b   :  { %v754_v61 = vpop.f32.mrb[16].mxu0  ;;  %v795_v62 = vpop.f32.mrb[16].mxu1 }
 0x52c   :  { %v802_v63 = vadd.f32 %v754_v61, %v715_v59  ;;  %v756_v34 = vpop.f32.mrb[17].mxu0  ;;  %v797_v36 = vpop.f32.mrb[17].mxu1  ;;  %v804_v35 = vadd.f32 %v795_v62, %v717_v6  ;;  %v1452_v6 = vld [vmem:[#allocation7 + $0x28] ss:$16 sps:$4 sm:$0xff]  }
 0x52d   :  { %v803_v37 = vadd.f32 %v756_v34, %v716_v60  ;;  %v758_v38 = vpop.f32.mrb[18].mxu0  ;;  %v799_v39 = vpop.f32.mrb[18].mxu1  ;;  %v805_v1 = vadd.f32 %v797_v36, %v718_v45  ;;  %v1450_v45 = vld [vmem:[#allocation7 + $0x2c] ss:$16 sps:$4 sm:$0xff]  }
 0x52e   :  { %v1250_v40 = vmul.f32 -1.442695, %v802_v63  ;;  %v759_v41 = vpop.f32.mrb[19].mxu0  ;;  %v800_v43 = vpop.f32.mrb[19].mxu1 }
 0x52f   :  { %v1251_v44 = vmul.f32 -1.442695, %v803_v37  ;;  %v1252_v46 = vmul.f32 -1.442695, %v805_v1  ;;  %v1447_v41 = vld [vmem:[#allocation7] ss:$16 sps:$4 sm:$0xff]  }
 0x530   :  { %1381 = vpow2.f32 %v1250_v40  ;;  %v1448_v43 = vld [vmem:[#allocation7 + $0x8] ss:$16 sps:$4 sm:$0xff]   ;;  %v1451_v1 = vld [vmem:[#allocation7 + $0x20] ss:$16 sps:$4 sm:$0xff]  }
 0x531   :  { %1383 = vpow2.f32 %v1251_v44  ;;  %v1449_v44 = vld [vmem:[#allocation7 + $0x24] ss:$16 sps:$4 sm:$0xff]  }
 0x532   :  { %1385 = vpow2.f32 %v1252_v46  ;;  %v1453_v46 = vld [vmem:[#allocation7 + $0x44] ss:$16 sps:$4 sm:$0xff]  }
 0x533   :  { %1387 = vtanh.f32 %v804_v35  ;;  %v1454_v35 = vld [vmem:[#allocation7 + $0x4c] ss:$16 sps:$4 sm:$0xff]  }
 0x53a   :  { %v1382_v47 = vpop.eup %1381 }
 0x53b   :  { %v1384_v49 = vpop.eup %1383  ;;  %v809_v50 = vadd.f32 1.0, %v1382_v47  ;;  %v1455_v47 = vld [vmem:[#allocation7 + $0x40] ss:$16 sps:$4 sm:$0xff]  }
 0x53c   :  { %v815_v51 = vadd.f32 1.0, %v1384_v49  ;;  %v1386_v52 = vpop.eup %1385  ;;  %v1456_v49 = vld [vmem:[#allocation7 + $0x48] ss:$16 sps:$4 sm:$0xff]  }
 0x53d   :  { %1389 = vrcp.f32 %v809_v50  ;;  %v1388_v42 = vpop.eup %1387  ;;  %v822_v57 = vadd.f32 1.0, %v1386_v52  ;;  %v1457_v50 = vld [vmem:[#allocation7 + $0x64] ss:$16 sps:$4 sm:$0xff]   ;;  %v1459_v52 = vld [vmem:[#allocation7 + $0x60] ss:$16 sps:$4 sm:$0xff]  }
 0x53e   :  { %1391 = vrcp.f32 %v815_v51  ;;  %v1458_v51 = vld [vmem:[#allocation7 + $0x6c] ss:$16 sps:$4 sm:$0xff]  }
 0x53f   :  { %1393 = vrcp.f32 %v822_v57  ;;  %v1465_v57 = vld [vmem:[#allocation7 + $0xa4] ss:$16 sps:$4 sm:$0xff]  }
 0x547   :  { %v1390_v53 = vpop.eup %1389 }
 0x548   :  { %v1392_v55 = vpop.eup %1391  ;;  %v826_v56 = vmul.f32 %v1390_v53, %v1388_v42  ;;  %v1460_v42 = vld [vmem:[#allocation7 + $0x68] ss:$16 sps:$4 sm:$0xff]   ;;  %v1462_v53 = vld [vmem:[#allocation7 + $0x8c] ss:$16 sps:$4 sm:$0xff]  }
 0x549   :  { %v825_v58 = vmul.f32 %v1392_v55, %v1843_v54  ;;  %v1394_v59 = vpop.eup %1393  ;;  %v1463_v55 = vld [vmem:[#allocation7 + $0x80] ss:$16 sps:$4 sm:$0xff]  }
 0x54b   :  { %v1881_v48 = vadd.f32 %v826_v56, %v825_v58  ;;  %v1464_v56 = vld [vmem:[#allocation7 + $0x88] ss:$16 sps:$4 sm:$0xff]   ;;  %v1466_v58 = vld [vmem:[#allocation7 + $0xac] ss:$16 sps:$4 sm:$0xff]  }
 0x54d   :  { %1395 = vtanh.f32 %v1881_v48 }
 0x557   :  { %v1396_v60 = vpop.eup %1395 }
 0x558   :  { %v829_v61 = vmul.f32 %v1396_v60, %v1394_v59  ;;  %v1468_v59 = vld [vmem:[#allocation7 + $0xa8] ss:$16 sps:$4 sm:$0xff]   ;;  %v1469_v60 = vld [vmem:[#allocation7 + $0xc4] ss:$16 sps:$4 sm:$0xff]  }
 0x55a   :  { %v837_v62 = vpack.c.bf16 %v829_v61, %v829_v61  ;;  %v1470_v61 = vld [vmem:[#allocation7 + $0xcc] ss:$16 sps:$4 sm:$0xff]  }
 0x55c   :  { %871 = vmatmul.mubr.bf16.vlgmr.msra.gmra.mrb[20].mxu0 %v837_v62  ;;  %912 = vmatmul.mubr.bf16.vlgmr.msra.gmra.mrb[20].mxu1 %v837_v62  ;;  %v1471_v62 = vld [vmem:[#allocation7 + $0xc0] ss:$16 sps:$4 sm:$0xff]  }
 0x55d   :  { %957 = vmatpush1.bf16.msra.mxu0 %v1599_v2  ;;  %998 = vmatpush1.bf16.msra.mxu1 %v1612_v7  ;;  %v1445_v2 = vld [vmem:[#allocation7 + $0x4] ss:$16 sps:$4 sm:$0xff]  }
 0x55e   :  { %958 = vmatprep.subr.bf16.mxu0 %v1602_v3  ;;  %999 = vmatprep.subr.bf16.mxu1 %v1622_v10  ;;  %v1446_v3 = vld [vmem:[#allocation7 + $0xc] ss:$16 sps:$4 sm:$0xff]  }
 0x55f   :  { %988 = vmatprep.mubr.bf16.mxu0 %v1553_v0  ;;  %1029 = vmatprep.mubr.bf16.mxu1 %v1553_v0 }
 0x561   :  { %959 = vmatpush1.bf16.msra.mxu0 %v1605_v4  ;;  %1000 = vmatpush1.bf16.msra.mxu1 %v1624_v11  ;;  %v831_v4 = vld [vmem:[#allocation4 + $0x50] sm:$0xff]  ;;  %v832_v11 = vld [vmem:[#allocation4 + $0x58] sm:$0xff] }
 0x562   :  { %960 = vmatprep.subr.bf16.mxu0 %v1608_v5  ;;  %1001 = vmatprep.subr.bf16.mxu1 %v1632_v14  ;;  %v833_v5 = vunpack.c.l.bf16 %v831_v4  ;;  %v834_v7 = vunpack.c.h.bf16 %v831_v4  ;;  %v1474_v4 = vld [vmem:[#allocation7 + $0xec] ss:$16 sps:$4 sm:$0xff]  }
 0x565   :  { %961 = vmatpush1.bf16.msra.mxu0 %v1615_v8  ;;  %1002 = vmatpush1.bf16.msra.mxu1 %v1636_v15 }
 0x566   :  { %962 = vmatprep.subr.bf16.mxu0 %v1619_v9  ;;  %1003 = vmatprep.subr.bf16.mxu1 %v1639_v16 }
 0x569   :  { %963 = vmatpush1.bf16.msra.mxu0 %v1628_v12  ;;  %1004 = vmatpush1.bf16.msra.mxu1 %v1648_v19 }
 0x56a   :  { %964 = vmatprep.subr.bf16.mxu0 %v1630_v13  ;;  %1005 = vmatprep.subr.bf16.mxu1 %v1651_v20 }
 0x56d   :  { %965 = vmatpush1.bf16.msra.mxu0 %v1642_v17  ;;  %1006 = vmatpush1.bf16.msra.mxu1 %v1660_v23  ;;  %v835_v23 = vunpack.c.l.bf16 %v832_v11 }
 0x56e   :  { %966 = vmatprep.subr.bf16.mxu0 %v1645_v18  ;;  %1007 = vmatprep.subr.bf16.mxu1 %v1663_v24 }
 0x571   :  { %967 = vmatpush1.bf16.msra.mxu0 %v1654_v21  ;;  %1008 = vmatpush1.bf16.msra.mxu1 %v1672_v27  ;;  %v836_v21 = vunpack.c.h.bf16 %v832_v11 }
 0x572   :  { %968 = vmatprep.subr.bf16.mxu0 %v1656_v22  ;;  %1009 = vmatprep.subr.bf16.mxu1 %v1675_v28 }
 0x575   :  { %969 = vmatpush1.bf16.msra.mxu0 %v1666_v25  ;;  %1010 = vmatpush1.bf16.msra.mxu1 %v1682_v30 }
 0x576   :  { %970 = vmatprep.subr.bf16.mxu0 %v1669_v26  ;;  %1011 = vmatprep.subr.bf16.mxu1 %v1685_v31 }
 0x579   :  { %971 = vmatpush1.bf16.msra.mxu0 %v1678_v29  ;;  %1012 = vmatpush1.bf16.msra.mxu1 %v1689_v32 }
 0x57a   :  { %1074 = vmatprep.subr.bf16.mxu0 %v1445_v2  ;;  %1115 = vmatprep.subr.bf16.mxu1 %v1446_v3  ;;  %v1472_v2 = vld [vmem:[#allocation7 + $0xc8] ss:$16 sps:$4 sm:$0xff]   ;;  %v1473_v3 = vld [vmem:[#allocation7 + $0xe4] ss:$16 sps:$4 sm:$0xff]  }
 0x62f   :  { %v872_v8 = vpop.f32.mrb[20].mxu0  ;;  %v913_v9 = vpop.f32.mrb[20].mxu1 }
 0x630   :  { %v920_v10 = vadd.f32 %v872_v8, %v833_v5  ;;  %v874_v12 = vpop.f32.mrb[21].mxu0  ;;  %v915_v13 = vpop.f32.mrb[21].mxu1  ;;  %v922_v25 = vadd.f32 %v913_v9, %v835_v23  ;;  %v1475_v5 = vld [vmem:[#allocation7 + $0xe0] ss:$16 sps:$4 sm:$0xff]  }
 0x631   :  { %v921_v14 = vadd.f32 %v874_v12, %v834_v7  ;;  %v876_v15 = vpop.f32.mrb[22].mxu0  ;;  %v917_v16 = vpop.f32.mrb[22].mxu1  ;;  %v923_v22 = vadd.f32 %v915_v13, %v836_v21  ;;  %v1476_v7 = vld [vmem:[#allocation7 + $0xe8] ss:$16 sps:$4 sm:$0xff]   ;;  %v949_v8 = vld [vmem:[#allocation4 + $0x60] sm:$0xff] }
 0x632   :  { %v1253_v17 = vmul.f32 -1.442695, %v920_v10  ;;  %v877_v18 = vpop.f32.mrb[23].mxu0  ;;  %v918_v19 = vpop.f32.mrb[23].mxu1  ;;  %v951_v9 = vunpack.c.l.bf16 %v949_v8  ;;  %v952_v10 = vunpack.c.h.bf16 %v949_v8 }
 0x633   :  { %v1254_v20 = vmul.f32 -1.442695, %v921_v14  ;;  %v1255_v24 = vmul.f32 -1.442695, %v923_v22  ;;  %v950_v14 = vld [vmem:[#allocation4 + $0x68] sm:$0xff] }
 0x634   :  { %1397 = vpow2.f32 %v1253_v17 }
 0x635   :  { %1399 = vpow2.f32 %v1254_v20 }
 0x636   :  { %1401 = vpow2.f32 %v1255_v24  ;;  %v954_v24 = vunpack.c.h.bf16 %v950_v14 }
 0x637   :  { %1403 = vtanh.f32 %v922_v25 }
 0x63e   :  { %v1398_v26 = vpop.eup %1397 }
 0x63f   :  { %v1400_v27 = vpop.eup %1399  ;;  %v927_v28 = vadd.f32 1.0, %v1398_v26  ;;  %v953_v26 = vunpack.c.l.bf16 %v950_v14 }
 0x640   :  { %v933_v29 = vadd.f32 1.0, %v1400_v27  ;;  %v1402_v30 = vpop.eup %1401 }
 0x641   :  { %1405 = vrcp.f32 %v927_v28  ;;  %v1404_v31 = vpop.eup %1403  ;;  %v940_v33 = vadd.f32 1.0, %v1402_v30 }
 0x642   :  { %1407 = vrcp.f32 %v933_v29 }
 0x643   :  { %1409 = vrcp.f32 %v940_v33 }
 0x64b   :  { %v1406_v32 = vpop.eup %1405 }
 0x64c   :  { %v1408_v54 = vpop.eup %1407  ;;  %v944_v63 = vmul.f32 %v1406_v32, %v1404_v31 }
 0x64d   :  { %v943_v34 = vmul.f32 %v1408_v54, %v1881_v48  ;;  %v1410_v37 = vpop.eup %1409  ;;  %v1467_v48 = vld [vmem:[#allocation7 + $0xa0] ss:$16 sps:$4 sm:$0xff]  }
 0x64f   :  { %v1917_v36 = vadd.f32 %v944_v63, %v943_v34 }
 0x651   :  { %1411 = vtanh.f32 %v1917_v36 }
 0x65b   :  { %v1412_v38 = vpop.eup %1411 }
 0x65c   :  { %v947_v39 = vmul.f32 %v1412_v38, %v1410_v37 }
 0x65e   :  { %v955_v40 = vpack.c.bf16 %v947_v39, %v947_v39 }
 0x660   :  { %989 = vmatmul.mubr.bf16.vlgmr.msra.gmra.mrb[24].mxu0 %v955_v40  ;;  %1030 = vmatmul.mubr.bf16.vlgmr.msra.gmra.mrb[24].mxu1 %v955_v40 }
 0x661   :  { %1075 = vmatpush1.bf16.msra.mxu0 %v1447_v41  ;;  %1116 = vmatpush1.bf16.msra.mxu1 %v1448_v43 }
 0x662   :  { %1076 = vmatprep.subr.bf16.mxu0 %v1449_v44  ;;  %1117 = vmatprep.subr.bf16.mxu1 %v1450_v45 }
 0x663   :  { %1106 = vmatprep.mubr.bf16.mxu0 %v1553_v0  ;;  %1147 = vmatprep.mubr.bf16.mxu1 %v1553_v0  ;;  %v1461_v0 = vld [vmem:[#allocation7 + $0x84] ss:$16 sps:$4 sm:$0xff]  }
 0x665   :  { %1077 = vmatpush1.bf16.msra.mxu0 %v1451_v1  ;;  %1118 = vmatpush1.bf16.msra.mxu1 %v1452_v6  ;;  %v1067_v1 = vld [vmem:[#allocation4 + $0x70] sm:$0xff] }
 0x666   :  { %1078 = vmatprep.subr.bf16.mxu0 %v1453_v46  ;;  %1119 = vmatprep.subr.bf16.mxu1 %v1454_v35  ;;  %v1069_v6 = vunpack.c.l.bf16 %v1067_v1  ;;  %v1070_v46 = vunpack.c.h.bf16 %v1067_v1 }
 0x669   :  { %1079 = vmatpush1.bf16.msra.mxu0 %v1455_v47  ;;  %1120 = vmatpush1.bf16.msra.mxu1 %v1456_v49 }
 0x66a   :  { %1080 = vmatprep.subr.bf16.mxu0 %v1457_v50  ;;  %1121 = vmatprep.subr.bf16.mxu1 %v1458_v51  ;;  %v1068_v50 = vld [vmem:[#allocation4 + $0x78] sm:$0xff] }
 0x66d   :  { %1081 = vmatpush1.bf16.msra.mxu0 %v1459_v52  ;;  %1122 = vmatpush1.bf16.msra.mxu1 %v1460_v42 }
 0x66e   :  { %1082 = vmatprep.subr.bf16.mxu0 %v1461_v0  ;;  %1123 = vmatprep.subr.bf16.mxu1 %v1462_v53 }
 0x671   :  { %1083 = vmatpush1.bf16.msra.mxu0 %v1463_v55  ;;  %1124 = vmatpush1.bf16.msra.mxu1 %v1464_v56 }
 0x672   :  { %1084 = vmatprep.subr.bf16.mxu0 %v1465_v57  ;;  %1125 = vmatprep.subr.bf16.mxu1 %v1466_v58  ;;  %v1072_v58 = vunpack.c.h.bf16 %v1068_v50 }
 0x675   :  { %1085 = vmatpush1.bf16.msra.mxu0 %v1467_v48  ;;  %1126 = vmatpush1.bf16.msra.mxu1 %v1468_v59  ;;  %v1071_v59 = vunpack.c.l.bf16 %v1068_v50 }
 0x676   :  { %1086 = vmatprep.subr.bf16.mxu0 %v1469_v60  ;;  %1127 = vmatprep.subr.bf16.mxu1 %v1470_v61 }
 0x679   :  { %1087 = vmatpush1.bf16.msra.mxu0 %v1471_v62  ;;  %1128 = vmatpush1.bf16.msra.mxu1 %v1472_v2 }
 0x67a   :  { %1088 = vmatprep.subr.bf16.mxu0 %v1473_v3  ;;  %1129 = vmatprep.subr.bf16.mxu1 %v1474_v4 }
 0x67d   :  { %1089 = vmatpush1.bf16.msra.mxu0 %v1475_v5  ;;  %1130 = vmatpush1.bf16.msra.mxu1 %v1476_v7 }
 0x733   :  { %v990_v11 = vpop.f32.mrb[24].mxu0  ;;  %v1031_v12 = vpop.f32.mrb[24].mxu1 }
 0x734   :  { %v1038_v13 = vadd.f32 %v990_v11, %v951_v9  ;;  %v992_v15 = vpop.f32.mrb[25].mxu0  ;;  %v1033_v16 = vpop.f32.mrb[25].mxu1  ;;  %v1040_v28 = vadd.f32 %v1031_v12, %v953_v26 }
 0x735   :  { %v1039_v17 = vadd.f32 %v992_v15, %v952_v10  ;;  %v994_v18 = vpop.f32.mrb[26].mxu0  ;;  %v1035_v19 = vpop.f32.mrb[26].mxu1  ;;  %v1041_v25 = vadd.f32 %v1033_v16, %v954_v24 }
 0x736   :  { %v1256_v20 = vmul.f32 -1.442695, %v1038_v13  ;;  %v995_v21 = vpop.f32.mrb[27].mxu0  ;;  %v1036_v22 = vpop.f32.mrb[27].mxu1 }
 0x737   :  { %v1257_v23 = vmul.f32 -1.442695, %v1039_v17  ;;  %v1258_v27 = vmul.f32 -1.442695, %v1041_v25 }
 0x738   :  { %1413 = vpow2.f32 %v1256_v20 }
 0x739   :  { %1415 = vpow2.f32 %v1257_v23 }
 0x73a   :  { %1417 = vpow2.f32 %v1258_v27 }
 0x73b   :  { %1419 = vtanh.f32 %v1040_v28 }
 0x742   :  { %v1414_v29 = vpop.eup %1413 }
 0x743   :  { %v1416_v30 = vpop.eup %1415  ;;  %v1045_v31 = vadd.f32 1.0, %v1414_v29 }
 0x744   :  { %v1051_v32 = vadd.f32 1.0, %v1416_v30  ;;  %v1418_v54 = vpop.eup %1417 }
 0x745   :  { %1421 = vrcp.f32 %v1045_v31  ;;  %v1420_v63 = vpop.eup %1419  ;;  %v1058_v38 = vadd.f32 1.0, %v1418_v54 }
 0x746   :  { %1423 = vrcp.f32 %v1051_v32 }
 0x747   :  { %1425 = vrcp.f32 %v1058_v38 }
 0x74f   :  { %v1422_v33 = vpop.eup %1421 }
 0x750   :  { %v1424_v34 = vpop.eup %1423  ;;  %v1062_v37 = vmul.f32 %v1422_v33, %v1420_v63 }
 0x751   :  { %v1061_v39 = vmul.f32 %v1424_v34, %v1917_v36  ;;  %v1426_v41 = vpop.eup %1425 }
 0x753   :  { %v1063_v40 = vadd.f32 %v1062_v37, %v1061_v39 }
 0x755   :  { %1427 = vtanh.f32 %v1063_v40 }
 0x75f   :  { %v1428_v43 = vpop.eup %1427 }
 0x760   :  { %v1065_v44 = vmul.f32 %v1428_v43, %v1426_v41 }
 0x762   :  { %v1073_v45 = vpack.c.bf16 %v1065_v44, %v1065_v44 }
 0x764   :  { %1107 = vmatmul.mubr.bf16.vlgmr.msra.gmra.mrb[28].mxu0 %v1073_v45  ;;  %1148 = vmatmul.mubr.bf16.vlgmr.msra.gmra.mrb[28].mxu1 %v1073_v45 }
 0x837   :  { %v1108_v35 = vpop.f32.mrb[28].mxu0  ;;  %v1149_v47 = vpop.f32.mrb[28].mxu1 }
 0x838   :  { %v1156_v49 = vadd.f32 %v1108_v35, %v1069_v6  ;;  %v1110_v51 = vpop.f32.mrb[29].mxu0  ;;  %v1151_v52 = vpop.f32.mrb[29].mxu1  ;;  %v1158_v61 = vadd.f32 %v1149_v47, %v1071_v59 }
 0x839   :  { %v1157_v42 = vadd.f32 %v1110_v51, %v1070_v46  ;;  %v1112_v36 = vpop.f32.mrb[30].mxu0  ;;  %v1153_v0 = vpop.f32.mrb[30].mxu1  ;;  %v1159_v48 = vadd.f32 %v1151_v52, %v1072_v58 }
 0x83a   :  { %v1259_v53 = vmul.f32 -1.442695, %v1156_v49  ;;  %v1113_v55 = vpop.f32.mrb[31].mxu0  ;;  %v1154_v56 = vpop.f32.mrb[31].mxu1 }
 0x83b   :  { %v1260_v57 = vmul.f32 -1.442695, %v1157_v42  ;;  %v1261_v60 = vmul.f32 -1.442695, %v1159_v48 }
 0x83c   :  { %1429 = vpow2.f32 %v1259_v53 }
 0x83d   :  { %1431 = vpow2.f32 %v1260_v57 }
 0x83e   :  { %1433 = vpow2.f32 %v1261_v60 }
 0x83f   :  { %1435 = vtanh.f32 %v1158_v61 }
 0x846   :  { %v1430_v62 = vpop.eup %1429 }
 0x847   :  { %v1432_v2 = vpop.eup %1431  ;;  %v1163_v3 = vadd.f32 1.0, %v1430_v62 }
 0x848   :  { %v1169_v4 = vadd.f32 1.0, %v1432_v2  ;;  %v1434_v5 = vpop.eup %1433 }
 0x849   :  { %1437 = vrcp.f32 %v1163_v3  ;;  %v1436_v7 = vpop.eup %1435  ;;  %v1176_v11 = vadd.f32 1.0, %v1434_v5 }
 0x84a   :  { %1439 = vrcp.f32 %v1169_v4 }
 0x84b   :  { %1441 = vrcp.f32 %v1176_v11 }
 0x853   :  { %v1438_v8 = vpop.eup %1437 }
 0x854   :  { %v1440_v9 = vpop.eup %1439  ;;  %v1180_v10 = vmul.f32 %v1438_v8, %v1436_v7 }
 0x855   :  { %v1179_v12 = vmul.f32 %v1440_v9, %v1063_v40  ;;  %v1442_v14 = vpop.eup %1441 }
 0x857   :  { %v1181_v13 = vadd.f32 %v1180_v10, %v1179_v12 }
 0x859   :  { %1443 = vtanh.f32 %v1181_v13 }
 0x863   :  { %v1444_v15 = vpop.eup %1443 }
 0x864   :  { %v1183_v16 = vmul.f32 %v1444_v15, %v1442_v14 }
 0x866   :  { %1189 = vst [vmem:[#allocation9] sm:$0xff] %v1183_v16 }
 0x867   :  { %1532 = shalt.err (!%p1529_p6)
}
 0x868   :  { %s1533_s10 = scalar_lea.hbm %s1937_s2, 128 }
 0x869   :  { %p1534_p7 = scmp.ne.s32.totalorder %s1937_s2, %s1533_s10  ;;  %p1537_p8 = scmp.lt.u32.totalorder %s1533_s10, %s1937_s2 }
 0x86b   :  { %p1539_p9 = pnand %p1537_p8, %p1534_p7 }
 0x86d   :  { %1542 = shalt.err (!%p1539_p9)
}
 0x86e   :  { %1199 = dma.vmem_to_hbm [thread:$0]  %s1197_s6, 128, %s1937_s2, [#allocation6]  }
 0x86f   :  { %1547 = dma.done.wait [#allocation6], 128  }
 0x870   :  { %1548 = vsyncadd [#allocation6], 4294967168 }
 0x871   :  { %1203 = vsyncpa [#allocation5], 1 }
 0x872   :  { %1204 = vsyncpa [#allocation8], 1 }
 0x873   :  { %1205 = vsyncpa [#allocation6], 1 }

</bundles_post_ra>
